<compile_context>
chip_gen: v5e
topology: v5e:2x2
jax: 0.10.0
libtpu: 0.0.40
codegen_flags: <defaults>
</compile_context>

<pallas_src>
import math

import jax
import jax.numpy as jnp
import numpy as np
from jax.experimental import pallas as pl
from jax.experimental.pallas import tpu as pltpu


# ----------------------------------------------------------------------------
# Helpers
# ----------------------------------------------------------------------------
def _vmem_limit_bytes():
    # v5e/v6e: 128 MiB physical -> 96 MiB scoped; v7x: 64 MiB physical -> 48 MiB scoped.
    try:
        cap = pltpu.get_tpu_info().vmem_capacity_bytes
        return int(min(cap * 3 // 4, 96 * 1024 * 1024))
    except Exception:
        return 48 * 1024 * 1024


def _pick_tile(n, candidates):
    for t in candidates:
        if n % t == 0:
            return t
    return n  # block == full array dims is always legal


# ----------------------------------------------------------------------------
# Linear (y = x @ W + b) Pallas kernel — bf16 MXU inputs (weights pre-cast), f32 accumulation.
# Only used for the tuple-path nn.Linear on inputs[1]; everything else is fused below.
# ----------------------------------------------------------------------------
def _linear_kernel(x_ref, w_ref, b_ref, o_ref):
    acc = jnp.dot(x_ref[...].astype(jnp.bfloat16), w_ref[...],
                  preferred_element_type=jnp.float32)
    o_ref[...] = (acc + b_ref[...]).astype(o_ref.dtype)


def pallas_linear(x2d, w, b):
    M, K = x2d.shape
    K2, N = w.shape
    assert K == K2
    TM = _pick_tile(M, (512, 256, 128, 64, 32, 16, 8))
    TN = _pick_tile(N, (512, 256, 128))
    w_bf16 = w.astype(jnp.bfloat16)                 # pre-cast in the wrapper (review item)
    return pl.pallas_call(
        _linear_kernel,
        out_shape=jax.ShapeDtypeStruct((M, N), x2d.dtype),
        grid=(M // TM, N // TN),
        in_specs=[
            pl.BlockSpec((TM, K), lambda i, j: (i, 0)),
            pl.BlockSpec((K, TN), lambda i, j: (0, j)),
            pl.BlockSpec((1, TN), lambda i, j: (0, j)),
        ],
        out_specs=pl.BlockSpec((TM, TN), lambda i, j: (i, j)),
        compiler_params=pltpu.CompilerParams(
            dimension_semantics=("parallel", "parallel"),
            vmem_limit_bytes=_vmem_limit_bytes(),
        ),
    )(x2d, w_bf16, b.reshape(1, N).astype(jnp.float32))


# ----------------------------------------------------------------------------
# Fused AutoCorrelation layer kernel (one batch element per grid step)
#
#   q = xq @ Wq + bq ;  [k|v] = xk @ [Wk|Wv] + b
#   corr[tau] = (1/(L*D)) sum_{t,d} q[(t+tau)%L, d] * k[t, d]     (circular correlation via DFT)
#   top-k over tau, softmax over selected correlations -> w[tau]
#   agg[t, :] = sum_tau w[tau] * v[(t+tau)%L, :]                  (circulant matmul via DFT)
#   out = agg @ Wo + bo
#
# DFT convention: C[f,t]=cos(2*pi*f*t/L), S[f,t]=sin(...), both symmetric.
#   Xhat = (C - iS)@X ; real IDFT(Y) = (1/L)(C@Re(Y) - S@Im(Y)) = (1/L) * [C|-S] @ [Re;Im]
# ----------------------------------------------------------------------------
def _make_fused_layer_kernel(L, D, top_k):
    inv_L = 1.0 / float(L)
    inv_LD = 1.0 / float(L * D)
    NEG = -1e30  # python literal -> no captured constants

    def kernel(xq_ref, xk_ref, wq_ref, bq_ref, wkv_ref, bkv_ref,
               wo_ref, bo_ref, cs_ref, ics_ref, o_ref):
        xq = xq_ref[0].astype(jnp.bfloat16)          # [L, D]
        xk = xk_ref[0].astype(jnp.bfloat16)          # [L, D]
        CS = cs_ref[...]                             # [2L, L]  (f32, = [C; S])
        ICS = ics_ref[...]                           # [L, 2L]  (f32, = [C | -S])

        # --- fused projections (bf16 MXU, f32 accumulation), QKV never touch HBM ---
        q = jnp.dot(xq, wq_ref[...], preferred_element_type=jnp.float32) + bq_ref[...]    # [L, D]
        kv = jnp.dot(xk, wkv_ref[...], preferred_element_type=jnp.float32) + bkv_ref[...]  # [L, 2D]
        k = kv[:, 0:D]
        v = kv[:, D:2 * D]

        # --- correlation / selection path (kept f32: feeds a discrete top-k) ---
        qk = jnp.concatenate([q, k], axis=1)                          # [L, 2D]
        F = jnp.dot(CS, qk, preferred_element_type=jnp.float32)       # [2L, 2D] fused fwd DFT
        qr = F[0:L, 0:D]
        qi = F[L:2 * L, 0:D]
        kr = F[0:L, D:2 * D]
        ki = F[L:2 * L, D:2 * D]
        r_re = qr * kr + qi * ki                                      # Qhat * conj(Khat)
        r_im = qr * ki - qi * kr
        # channel mean commutes with the IDFT: reduce over d first, then a tiny [L,2L]@[2L,1]
        rri = jnp.concatenate([jnp.sum(r_re, axis=1, keepdims=True),
                               jnp.sum(r_im, axis=1, keepdims=True)], axis=0)   # [2L, 1]
        corr = jnp.dot(ICS, rri, preferred_element_type=jnp.float32) * inv_LD   # [L, 1]

        # top-k delay selection (iterative argmax, min-index tie-break)
        tau = jax.lax.broadcasted_iota(jnp.int32, (L, 1), 0)
        sel = tau < 0                      # all-False, no constant capture
        cur = corr
        for _ in range(top_k):
            m = jnp.max(cur)
            idx = jnp.min(jnp.where(cur == m, tau, L))
            hit = tau == idx
            sel = jnp.logical_or(sel, hit)
            cur = jnp.where(hit, NEG, cur)

        # softmax over the selected correlations
        m0 = jnp.max(corr)
        e = jnp.where(sel, jnp.exp(corr - m0), 0.0)
        w = e / jnp.sum(e)                                            # [L, 1]

        # --- aggregation path (bf16 MXU); vr/vi computed late so qr..ki are dead first ---
        Fw = jnp.dot(CS, w, preferred_element_type=jnp.float32)       # [2L, 1]  (tiny)
        wr = Fw[0:L, :]
        wi = Fw[L:2 * L, :]
        Fv = jnp.dot(CS.astype(jnp.bfloat16), v.astype(jnp.bfloat16),
                     preferred_element_type=jnp.float32)              # [2L, D]
        vr = Fv[0:L, :]
        vi = Fv[L:2 * L, :]
        g = jnp.concatenate([vr * wr + vi * wi,                        # Re(Vhat * conj(What))
                             vr * wi - vi * wr], axis=0)               # Im(...)   -> [2L, D]
        agg = jnp.dot(ICS.astype(jnp.bfloat16), g.astype(jnp.bfloat16),
                      preferred_element_type=jnp.float32) * inv_L      # [L, D]

        # --- fused output projection ---
        out = jnp.dot(agg.astype(jnp.bfloat16), wo_ref[...],
                      preferred_element_type=jnp.float32) + bo_ref[...]
        o_ref[0] = out.astype(o_ref.dtype)

    return kernel


def _fused_autocorr_layer(xq, xk, params, *, c):
    B, L, D = xq.shape
    top_k = max(1, min(L, int(c * math.log(L))))

    # Stacked DFT basis (shared across batch; constant block index -> fetched once).
    f = jnp.arange(L, dtype=jnp.float32)
    ang = (2.0 * math.pi / L) * (f[:, None] * f[None, :])
    C = jnp.cos(ang)
    S = jnp.sin(ang)
    CS = jnp.concatenate([C, S], axis=0)        # [2L, L]
    ICS = jnp.concatenate([C, -S], axis=1)      # [L, 2L]

    # Pre-cast weights to bf16 in the wrapper; biases stay f32 (added post-accumulation).
    wq = params["wq"].astype(jnp.bfloat16)
    wkv = jnp.concatenate([params["wk"], params["wv"]], axis=1).astype(jnp.bfloat16)
    wo = params["wo"].astype(jnp.bfloat16)
    bq = params["bq"].reshape(1, D).astype(jnp.float32)
    bkv = jnp.concatenate([params["bk"], params["bv"]], axis=0).reshape(1, 2 * D).astype(jnp.float32)
    bo = params["bo"].reshape(1, D).astype(jnp.float32)

    kernel = _make_fused_layer_kernel(L, D, top_k)
    const = lambda b: (0, 0)
    return pl.pallas_call(
        kernel,
        out_shape=jax.ShapeDtypeStruct((B, L, D), xq.dtype),
        grid=(B,),
        in_specs=[
            pl.BlockSpec((1, L, D), lambda b: (b, 0, 0)),   # xq
            pl.BlockSpec((1, L, D), lambda b: (b, 0, 0)),   # xk (source for K/V)
            pl.BlockSpec((D, D), const),                    # Wq (bf16)
            pl.BlockSpec((1, D), const),                    # bq
            pl.BlockSpec((D, 2 * D), const),                # [Wk|Wv] (bf16)
            pl.BlockSpec((1, 2 * D), const),                # [bk;bv]
            pl.BlockSpec((D, D), const),                    # Wo (bf16)
            pl.BlockSpec((1, D), const),                    # bo
            pl.BlockSpec((2 * L, L), const),                # CS  (f32)
            pl.BlockSpec((L, 2 * L), const),                # ICS (f32)
        ],
        out_specs=pl.BlockSpec((1, L, D), lambda b: (b, 0, 0)),
        compiler_params=pltpu.CompilerParams(
            dimension_semantics=("parallel",),
            vmem_limit_bytes=_vmem_limit_bytes(),
        ),
    )(xq, xk, wq, bq, wkv, bkv, wo, bo, CS, ICS)


# ----------------------------------------------------------------------------
# Parameter init + full forward (glue in plain JAX, compute in Pallas)
# ----------------------------------------------------------------------------
def init_params(key, d_model):
    ks = jax.random.split(key, 10)
    s = 1.0 / math.sqrt(d_model)

    def w(k):
        return jax.random.normal(k, (d_model, d_model), jnp.float32) * s

    def b(k):
        return jax.random.normal(k, (d_model,), jnp.float32) * 0.01

    return dict(
        wq=w(ks[0]), bq=b(ks[1]),
        wk=w(ks[2]), bk=b(ks[3]),
        wv=w(ks[4]), bv=b(ks[5]),
        wo=w(ks[6]), bo=b(ks[7]),
        lin_w=w(ks[8]), lin_b=b(ks[9]),
    )


def autocorrelation_layer_forward(inputs, params, *, c, heads, output_len):
    if isinstance(inputs, tuple):
        q_src, k_in = inputs
        B, L, D = q_src.shape
        # tuple path: k = v = nn.Linear(inputs[1]); the K/V projections happen inside the
        # fused kernel, so only this Linear needs a separate (tiled) matmul kernel.
        k_src = pallas_linear(k_in.reshape(B * L, D), params["lin_w"],
                              params["lin_b"]).reshape(B, L, D)
    else:
        q_src = inputs
        B, L, D = q_src.shape
        k_src = q_src
    return _fused_autocorr_layer(q_src, k_src, params, c=c)


# ----------------------------------------------------------------------------
# Pure-JAX reference (direct roll-based autocorrelation; bf16-input projections like the kernel)
# ----------------------------------------------------------------------------
def _ref_linear(x2d, w, b):
    return jnp.dot(x2d.astype(jnp.bfloat16), w.astype(jnp.bfloat16),
                   preferred_element_type=jnp.float32) + b


def _ref_autocorr(Q, K, V, c):
    B, L, D = Q.shape
    top_k = max(1, min(L, int(c * math.log(L))))
    t = jnp.arange(L)
    gather_idx = (t[None, :] + t[:, None]) % L          # [tau, t] -> (t + tau) % L

    def one(q, k, v):
        qg = q[gather_idx]                               # [L(tau), L(t), D]
        corr = jnp.einsum("xtd,td->x", qg, k) / D        # [L]
        vals, inds = jax.lax.top_k(corr, top_k)
        w_sel = jax.nn.softmax(vals)
        vg = v[(t[None, :] + inds[:, None]) % L]         # [k, L, D]
        return jnp.einsum("j,jtd->td", w_sel, vg)

    return jax.vmap(one)(Q, K, V)


def ref_forward(inputs, params, *, c, heads, output_len):
    if isinstance(inputs, tuple):
        q_in, k_src = inputs
        B, L, D = q_in.shape
        k_lin = _ref_linear(k_src.reshape(-1, D), params["lin_w"], params["lin_b"])
        Q = _ref_linear(q_in.reshape(-1, D), params["wq"], params["bq"]).reshape(B, L, D)
        K = _ref_linear(k_lin, params["wk"], params["bk"]).reshape(B, L, D)
        V = _ref_linear(k_lin, params["wv"], params["bv"]).reshape(B, L, D)
    else:
        x = inputs
        B, L, D = x.shape
        Q = _ref_linear(x.reshape(-1, D), params["wq"], params["bq"]).reshape(B, L, D)
        K = _ref_linear(x.reshape(-1, D), params["wk"], params["bk"]).reshape(B, L, D)
        V = _ref_linear(x.reshape(-1, D), params["wv"], params["bv"]).reshape(B, L, D)
    agg = _ref_autocorr(Q, K, V, c)
    return _ref_linear(agg.reshape(-1, D), params["wo"], params["bo"]).reshape(B, L, D)


if __name__ == "__main__":
    B, L, D, H = 2, 16, 128, 4   # d_model=128 keeps every output lane-dense (multiple of 128)
    c = 2.0
    key = jax.random.PRNGKey(0)
    kp, kx, kq, kk = jax.random.split(key, 4)

    params = init_params(kp, D)

    # non-tuple path: q = k = v = inputs
    x = jax.random.normal(kx, (B, L, D), jnp.float32)
    out1 = autocorrelation_layer_forward(x, params, c=c, heads=H, output_len=L)
    ref1 = ref_forward(x, params, c=c, heads=H, output_len=L)

    # tuple path: k = v = Linear(inputs[1])
    q_in = jax.random.normal(kq, (B, L, D), jnp.float32)
    k_in = jax.random.normal(kk, (B, L, D), jnp.float32)
    out2 = autocorrelation_layer_forward((q_in, k_in), params, c=c, heads=H, output_len=L)
    ref2 = ref_forward((q_in, k_in), params, c=c, heads=H, output_len=L)

    jax.block_until_ready((out1, out2, ref1, ref2))
    assert out1.shape == (B, L, D) and out2.shape == (B, L, D)
    # tolerance covers bf16 MXU operands on the V/aggregation path (selection path stays f32)
    np.testing.assert_allclose(np.asarray(out1), np.asarray(ref1), rtol=3e-2, atol=3e-2)
    np.testing.assert_allclose(np.asarray(out2), np.asarray(ref2), rtol=3e-2, atol=3e-2)
    print("KERNEL_OK")
</pallas_src>

<mosaic_0001>
module attributes {stable_mosaic.version = 11 : i64} {
  func.func @kernel(%arg0: i32, %arg1: memref<1x16x128xf32, #tpu.memory_space<vmem>>, %arg2: memref<1x16x128xf32, #tpu.memory_space<vmem>>, %arg3: memref<128x128xbf16, #tpu.memory_space<vmem>>, %arg4: memref<1x128xf32, #tpu.memory_space<vmem>>, %arg5: memref<128x256xbf16, #tpu.memory_space<vmem>>, %arg6: memref<1x256xf32, #tpu.memory_space<vmem>>, %arg7: memref<128x128xbf16, #tpu.memory_space<vmem>>, %arg8: memref<1x128xf32, #tpu.memory_space<vmem>>, %arg9: memref<32x16xf32, #tpu.memory_space<vmem>>, %arg10: memref<16x32xf32, #tpu.memory_space<vmem>>, %arg11: memref<1x16x128xf32, #tpu.memory_space<vmem>>) attributes {dimension_semantics = [#tpu.dimension_semantics<parallel>], iteration_bounds = array<i64: 2>, scalar_prefetch = 0 : i64, scratch_operands = 0 : i64, tpu.core_type = #tpu.core_type<tc>, window_params = [{transform_indices = @transform_0, window_bounds = array<i64: 1, 16, 128>}, {transform_indices = @transform_1, window_bounds = array<i64: 1, 16, 128>}, {pipeline_mode = #tpu.pipeline_mode<synchronous>, transform_indices = @transform_2, window_bounds = array<i64: 128, 128>}, {pipeline_mode = #tpu.pipeline_mode<synchronous>, transform_indices = @transform_3, window_bounds = array<i64: 1, 128>}, {pipeline_mode = #tpu.pipeline_mode<synchronous>, transform_indices = @transform_4, window_bounds = array<i64: 128, 256>}, {pipeline_mode = #tpu.pipeline_mode<synchronous>, transform_indices = @transform_5, window_bounds = array<i64: 1, 256>}, {pipeline_mode = #tpu.pipeline_mode<synchronous>, transform_indices = @transform_6, window_bounds = array<i64: 128, 128>}, {pipeline_mode = #tpu.pipeline_mode<synchronous>, transform_indices = @transform_7, window_bounds = array<i64: 1, 128>}, {pipeline_mode = #tpu.pipeline_mode<synchronous>, transform_indices = @transform_8, window_bounds = array<i64: 32, 16>}, {pipeline_mode = #tpu.pipeline_mode<synchronous>, transform_indices = @transform_9, window_bounds = array<i64: 16, 32>}, {transform_indices = @transform_10, window_bounds = array<i64: 1, 16, 128>}]} {
    %c0 = arith.constant 0 : index
    %c0_0 = arith.constant 0 : index
    %c0_1 = arith.constant 0 : index
    %0 = vector.load %arg1[%c0, %c0_0, %c0_1] : memref<1x16x128xf32, #tpu.memory_space<vmem>>, vector<1x16x128xf32>
    %1 = vector.shape_cast %0 : vector<1x16x128xf32> to vector<16x128xf32>
    %2 = arith.truncf %1 : vector<16x128xf32> to vector<16x128xbf16>
    %c0_2 = arith.constant 0 : index
    %c0_3 = arith.constant 0 : index
    %c0_4 = arith.constant 0 : index
    %3 = vector.load %arg2[%c0_2, %c0_3, %c0_4] : memref<1x16x128xf32, #tpu.memory_space<vmem>>, vector<1x16x128xf32>
    %4 = vector.shape_cast %3 : vector<1x16x128xf32> to vector<16x128xf32>
    %5 = arith.truncf %4 : vector<16x128xf32> to vector<16x128xbf16>
    %c0_5 = arith.constant 0 : index
    %c0_6 = arith.constant 0 : index
    %6 = vector.load %arg9[%c0_5, %c0_6] : memref<32x16xf32, #tpu.memory_space<vmem>>, vector<32x16xf32>
    %c0_7 = arith.constant 0 : index
    %c0_8 = arith.constant 0 : index
    %7 = vector.load %arg10[%c0_7, %c0_8] : memref<16x32xf32, #tpu.memory_space<vmem>>, vector<16x32xf32>
    %c0_9 = arith.constant 0 : index
    %c0_10 = arith.constant 0 : index
    %8 = vector.load %arg3[%c0_9, %c0_10] : memref<128x128xbf16, #tpu.memory_space<vmem>>, vector<128x128xbf16>
    %cst = arith.constant dense<0.000000e+00> : vector<16x128xf32>
    %9 = tpu.matmul %2, %8, %cst {dimension_numbers = #tpu.dot_dimension_numbers<[1], [0], [0], [1], [0, 0, 1, 1], [], []>} : vector<16x128xbf16>, vector<128x128xbf16>, vector<16x128xf32> -> vector<16x128xf32>
    %c0_11 = arith.constant 0 : index
    %c0_12 = arith.constant 0 : index
    %10 = vector.load %arg4[%c0_11, %c0_12] : memref<1x128xf32, #tpu.memory_space<vmem>>, vector<1x128xf32>
    %11 = vector.broadcast %10 : vector<1x128xf32> to vector<16x128xf32>
    %12 = arith.addf %9, %11 : vector<16x128xf32>
    %c0_13 = arith.constant 0 : index
    %c0_14 = arith.constant 0 : index
    %13 = vector.load %arg5[%c0_13, %c0_14] : memref<128x256xbf16, #tpu.memory_space<vmem>>, vector<128x256xbf16>
    %cst_15 = arith.constant dense<0.000000e+00> : vector<16x256xf32>
    %14 = tpu.matmul %5, %13, %cst_15 {dimension_numbers = #tpu.dot_dimension_numbers<[1], [0], [0], [1], [0, 0, 1, 1], [], []>} : vector<16x128xbf16>, vector<128x256xbf16>, vector<16x256xf32> -> vector<16x256xf32>
    %c0_16 = arith.constant 0 : index
    %c0_17 = arith.constant 0 : index
    %15 = vector.load %arg6[%c0_16, %c0_17] : memref<1x256xf32, #tpu.memory_space<vmem>>, vector<1x256xf32>
    %16 = vector.broadcast %15 : vector<1x256xf32> to vector<16x256xf32>
    %17 = arith.addf %14, %16 : vector<16x256xf32>
    %18 = vector.extract_strided_slice %17 {offsets = [0, 0], sizes = [16, 128], strides = [1, 1]} : vector<16x256xf32> to vector<16x128xf32>
    %19 = vector.extract_strided_slice %17 {offsets = [0, 128], sizes = [16, 128], strides = [1, 1]} : vector<16x256xf32> to vector<16x128xf32>
    %20 = tpu.concatenate %12, %18 in 1 : vector<16x128xf32>, vector<16x128xf32> -> vector<16x256xf32>
    %cst_18 = arith.constant dense<0.000000e+00> : vector<32x256xf32>
    %21 = tpu.matmul %6, %20, %cst_18 {dimension_numbers = #tpu.dot_dimension_numbers<[1], [0], [0], [1], [0, 0, 1, 1], [], []>} : vector<32x16xf32>, vector<16x256xf32>, vector<32x256xf32> -> vector<32x256xf32>
    %22 = vector.extract_strided_slice %21 {offsets = [0, 0], sizes = [16, 128], strides = [1, 1]} : vector<32x256xf32> to vector<16x128xf32>
    %23 = vector.extract_strided_slice %21 {offsets = [16, 0], sizes = [16, 128], strides = [1, 1]} : vector<32x256xf32> to vector<16x128xf32>
    %24 = vector.extract_strided_slice %21 {offsets = [0, 128], sizes = [16, 128], strides = [1, 1]} : vector<32x256xf32> to vector<16x128xf32>
    %25 = vector.extract_strided_slice %21 {offsets = [16, 128], sizes = [16, 128], strides = [1, 1]} : vector<32x256xf32> to vector<16x128xf32>
    %26 = arith.mulf %22, %24 : vector<16x128xf32>
    %27 = arith.mulf %23, %25 : vector<16x128xf32>
    %28 = arith.addf %26, %27 : vector<16x128xf32>
    %29 = arith.mulf %22, %25 : vector<16x128xf32>
    %30 = arith.mulf %23, %24 : vector<16x128xf32>
    %31 = arith.subf %29, %30 : vector<16x128xf32>
    %cst_19 = arith.constant dense<0.000000e+00> : vector<16xf32>
    %32 = vector.multi_reduction <add>, %28, %cst_19 [1] : vector<16x128xf32> to vector<16xf32>
    %33 = vector.shape_cast %32 : vector<16xf32> to vector<16x1xf32>
    %cst_20 = arith.constant dense<0.000000e+00> : vector<16xf32>
    %34 = vector.multi_reduction <add>, %31, %cst_20 [1] : vector<16x128xf32> to vector<16xf32>
    %35 = vector.shape_cast %34 : vector<16xf32> to vector<16x1xf32>
    %36 = tpu.concatenate %33, %35 in 0 : vector<16x1xf32>, vector<16x1xf32> -> vector<32x1xf32>
    %cst_21 = arith.constant dense<0.000000e+00> : vector<16x1xf32>
    %37 = tpu.matmul %7, %36, %cst_21 {dimension_numbers = #tpu.dot_dimension_numbers<[1], [0], [0], [1], [0, 0, 1, 1], [], []>} : vector<16x32xf32>, vector<32x1xf32>, vector<16x1xf32> -> vector<16x1xf32>
    %cst_22 = arith.constant 4.8828125E-4 : f32
    %38 = vector.broadcast %cst_22 : f32 to vector<16x1xf32>
    %39 = arith.mulf %37, %38 : vector<16x1xf32>
    %40 = tpu.iota {dimensions = array<i32: 0>} : vector<16x1xi32>
    %c0_i32 = arith.constant 0 : i32
    %41 = vector.broadcast %c0_i32 : i32 to vector<16x1xi32>
    %42 = arith.cmpi slt, %40, %41 : vector<16x1xi32>
    %43 = vector.shape_cast %39 : vector<16x1xf32> to vector<1x16x1xf32>
    %cst_23 = arith.constant dense<0xFF800000> : vector<1xf32>
    %44 = vector.multi_reduction <maximumf>, %43, %cst_23 [1, 2] : vector<1x16x1xf32> to vector<1xf32>
    %45 = vector.shape_cast %44 : vector<1xf32> to vector<1x1x1xf32>
    %46 = vector.extract %45[0, 0, 0] : f32 from vector<1x1x1xf32>
    %47 = vector.broadcast %46 : f32 to vector<16x1xf32>
    %48 = arith.cmpf oeq, %39, %47 : vector<16x1xf32>
    %c16_i32 = arith.constant 16 : i32
    %49 = vector.broadcast %c16_i32 : i32 to vector<16x1xi32>
    %50 = arith.select %48, %40, %49 : vector<16x1xi1>, vector<16x1xi32>
    %51 = vector.shape_cast %50 : vector<16x1xi32> to vector<1x16x1xi32>
    %cst_24 = arith.constant dense<2147483647> : vector<1xi32>
    %52 = vector.multi_reduction <minsi>, %51, %cst_24 [1, 2] : vector<1x16x1xi32> to vector<1xi32>
    %53 = vector.shape_cast %52 : vector<1xi32> to vector<1x1x1xi32>
    %54 = vector.extract %53[0, 0, 0] : i32 from vector<1x1x1xi32>
    %55 = vector.broadcast %54 : i32 to vector<16x1xi32>
    %56 = arith.cmpi eq, %40, %55 : vector<16x1xi32>
    %57 = arith.ori %42, %56 : vector<16x1xi1>
    %cst_25 = arith.constant -1.000000e+30 : f32
    %58 = vector.broadcast %cst_25 : f32 to vector<16x1xf32>
    %59 = arith.select %56, %58, %39 : vector<16x1xi1>, vector<16x1xf32>
    %60 = vector.shape_cast %59 : vector<16x1xf32> to vector<1x16x1xf32>
    %cst_26 = arith.constant dense<0xFF800000> : vector<1xf32>
    %61 = vector.multi_reduction <maximumf>, %60, %cst_26 [1, 2] : vector<1x16x1xf32> to vector<1xf32>
    %62 = vector.shape_cast %61 : vector<1xf32> to vector<1x1x1xf32>
    %63 = vector.extract %62[0, 0, 0] : f32 from vector<1x1x1xf32>
    %64 = vector.broadcast %63 : f32 to vector<16x1xf32>
    %65 = arith.cmpf oeq, %59, %64 : vector<16x1xf32>
    %c16_i32_27 = arith.constant 16 : i32
    %66 = vector.broadcast %c16_i32_27 : i32 to vector<16x1xi32>
    %67 = arith.select %65, %40, %66 : vector<16x1xi1>, vector<16x1xi32>
    %68 = vector.shape_cast %67 : vector<16x1xi32> to vector<1x16x1xi32>
    %cst_28 = arith.constant dense<2147483647> : vector<1xi32>
    %69 = vector.multi_reduction <minsi>, %68, %cst_28 [1, 2] : vector<1x16x1xi32> to vector<1xi32>
    %70 = vector.shape_cast %69 : vector<1xi32> to vector<1x1x1xi32>
    %71 = vector.extract %70[0, 0, 0] : i32 from vector<1x1x1xi32>
    %72 = vector.broadcast %71 : i32 to vector<16x1xi32>
    %73 = arith.cmpi eq, %40, %72 : vector<16x1xi32>
    %74 = arith.ori %57, %73 : vector<16x1xi1>
    %cst_29 = arith.constant -1.000000e+30 : f32
    %75 = vector.broadcast %cst_29 : f32 to vector<16x1xf32>
    %76 = arith.select %73, %75, %59 : vector<16x1xi1>, vector<16x1xf32>
    %77 = vector.shape_cast %76 : vector<16x1xf32> to vector<1x16x1xf32>
    %cst_30 = arith.constant dense<0xFF800000> : vector<1xf32>
    %78 = vector.multi_reduction <maximumf>, %77, %cst_30 [1, 2] : vector<1x16x1xf32> to vector<1xf32>
    %79 = vector.shape_cast %78 : vector<1xf32> to vector<1x1x1xf32>
    %80 = vector.extract %79[0, 0, 0] : f32 from vector<1x1x1xf32>
    %81 = vector.broadcast %80 : f32 to vector<16x1xf32>
    %82 = arith.cmpf oeq, %76, %81 : vector<16x1xf32>
    %c16_i32_31 = arith.constant 16 : i32
    %83 = vector.broadcast %c16_i32_31 : i32 to vector<16x1xi32>
    %84 = arith.select %82, %40, %83 : vector<16x1xi1>, vector<16x1xi32>
    %85 = vector.shape_cast %84 : vector<16x1xi32> to vector<1x16x1xi32>
    %cst_32 = arith.constant dense<2147483647> : vector<1xi32>
    %86 = vector.multi_reduction <minsi>, %85, %cst_32 [1, 2] : vector<1x16x1xi32> to vector<1xi32>
    %87 = vector.shape_cast %86 : vector<1xi32> to vector<1x1x1xi32>
    %88 = vector.extract %87[0, 0, 0] : i32 from vector<1x1x1xi32>
    %89 = vector.broadcast %88 : i32 to vector<16x1xi32>
    %90 = arith.cmpi eq, %40, %89 : vector<16x1xi32>
    %91 = arith.ori %74, %90 : vector<16x1xi1>
    %cst_33 = arith.constant -1.000000e+30 : f32
    %92 = vector.broadcast %cst_33 : f32 to vector<16x1xf32>
    %93 = arith.select %90, %92, %76 : vector<16x1xi1>, vector<16x1xf32>
    %94 = vector.shape_cast %93 : vector<16x1xf32> to vector<1x16x1xf32>
    %cst_34 = arith.constant dense<0xFF800000> : vector<1xf32>
    %95 = vector.multi_reduction <maximumf>, %94, %cst_34 [1, 2] : vector<1x16x1xf32> to vector<1xf32>
    %96 = vector.shape_cast %95 : vector<1xf32> to vector<1x1x1xf32>
    %97 = vector.extract %96[0, 0, 0] : f32 from vector<1x1x1xf32>
    %98 = vector.broadcast %97 : f32 to vector<16x1xf32>
    %99 = arith.cmpf oeq, %93, %98 : vector<16x1xf32>
    %c16_i32_35 = arith.constant 16 : i32
    %100 = vector.broadcast %c16_i32_35 : i32 to vector<16x1xi32>
    %101 = arith.select %99, %40, %100 : vector<16x1xi1>, vector<16x1xi32>
    %102 = vector.shape_cast %101 : vector<16x1xi32> to vector<1x16x1xi32>
    %cst_36 = arith.constant dense<2147483647> : vector<1xi32>
    %103 = vector.multi_reduction <minsi>, %102, %cst_36 [1, 2] : vector<1x16x1xi32> to vector<1xi32>
    %104 = vector.shape_cast %103 : vector<1xi32> to vector<1x1x1xi32>
    %105 = vector.extract %104[0, 0, 0] : i32 from vector<1x1x1xi32>
    %106 = vector.broadcast %105 : i32 to vector<16x1xi32>
    %107 = arith.cmpi eq, %40, %106 : vector<16x1xi32>
    %108 = arith.ori %91, %107 : vector<16x1xi1>
    %cst_37 = arith.constant -1.000000e+30 : f32
    %109 = vector.broadcast %cst_37 : f32 to vector<16x1xf32>
    %110 = arith.select %107, %109, %93 : vector<16x1xi1>, vector<16x1xf32>
    %111 = vector.shape_cast %110 : vector<16x1xf32> to vector<1x16x1xf32>
    %cst_38 = arith.constant dense<0xFF800000> : vector<1xf32>
    %112 = vector.multi_reduction <maximumf>, %111, %cst_38 [1, 2] : vector<1x16x1xf32> to vector<1xf32>
    %113 = vector.shape_cast %112 : vector<1xf32> to vector<1x1x1xf32>
    %114 = vector.extract %113[0, 0, 0] : f32 from vector<1x1x1xf32>
    %115 = vector.broadcast %114 : f32 to vector<16x1xf32>
    %116 = arith.cmpf oeq, %110, %115 : vector<16x1xf32>
    %c16_i32_39 = arith.constant 16 : i32
    %117 = vector.broadcast %c16_i32_39 : i32 to vector<16x1xi32>
    %118 = arith.select %116, %40, %117 : vector<16x1xi1>, vector<16x1xi32>
    %119 = vector.shape_cast %118 : vector<16x1xi32> to vector<1x16x1xi32>
    %cst_40 = arith.constant dense<2147483647> : vector<1xi32>
    %120 = vector.multi_reduction <minsi>, %119, %cst_40 [1, 2] : vector<1x16x1xi32> to vector<1xi32>
    %121 = vector.shape_cast %120 : vector<1xi32> to vector<1x1x1xi32>
    %122 = vector.extract %121[0, 0, 0] : i32 from vector<1x1x1xi32>
    %123 = vector.broadcast %122 : i32 to vector<16x1xi32>
    %124 = arith.cmpi eq, %40, %123 : vector<16x1xi32>
    %125 = arith.ori %108, %124 : vector<16x1xi1>
    %126 = vector.shape_cast %39 : vector<16x1xf32> to vector<1x16x1xf32>
    %cst_41 = arith.constant dense<0xFF800000> : vector<1xf32>
    %127 = vector.multi_reduction <maximumf>, %126, %cst_41 [1, 2] : vector<1x16x1xf32> to vector<1xf32>
    %128 = vector.shape_cast %127 : vector<1xf32> to vector<1x1x1xf32>
    %129 = vector.extract %128[0, 0, 0] : f32 from vector<1x1x1xf32>
    %130 = vector.broadcast %129 : f32 to vector<16x1xf32>
    %131 = arith.subf %39, %130 : vector<16x1xf32>
    %132 = math.exp %131 : vector<16x1xf32>
    %cst_42 = arith.constant 0.000000e+00 : f32
    %133 = vector.broadcast %cst_42 : f32 to vector<16x1xf32>
    %134 = arith.select %125, %132, %133 : vector<16x1xi1>, vector<16x1xf32>
    %135 = vector.shape_cast %134 : vector<16x1xf32> to vector<1x16x1xf32>
    %cst_43 = arith.constant dense<0.000000e+00> : vector<1xf32>
    %136 = vector.multi_reduction <add>, %135, %cst_43 [1, 2] : vector<1x16x1xf32> to vector<1xf32>
    %137 = vector.shape_cast %136 : vector<1xf32> to vector<1x1x1xf32>
    %138 = vector.extract %137[0, 0, 0] : f32 from vector<1x1x1xf32>
    %139 = vector.broadcast %138 : f32 to vector<16x1xf32>
    %140 = arith.divf %134, %139 : vector<16x1xf32>
    %cst_44 = arith.constant dense<0.000000e+00> : vector<32x1xf32>
    %141 = tpu.matmul %6, %140, %cst_44 {dimension_numbers = #tpu.dot_dimension_numbers<[1], [0], [0], [1], [0, 0, 1, 1], [], []>} : vector<32x16xf32>, vector<16x1xf32>, vector<32x1xf32> -> vector<32x1xf32>
    %142 = vector.extract_strided_slice %141 {offsets = [0, 0], sizes = [16, 1], strides = [1, 1]} : vector<32x1xf32> to vector<16x1xf32>
    %143 = vector.extract_strided_slice %141 {offsets = [16, 0], sizes = [16, 1], strides = [1, 1]} : vector<32x1xf32> to vector<16x1xf32>
    %144 = arith.truncf %6 : vector<32x16xf32> to vector<32x16xbf16>
    %145 = arith.truncf %19 : vector<16x128xf32> to vector<16x128xbf16>
    %cst_45 = arith.constant dense<0.000000e+00> : vector<32x128xf32>
    %146 = tpu.matmul %144, %145, %cst_45 {dimension_numbers = #tpu.dot_dimension_numbers<[1], [0], [0], [1], [0, 0, 1, 1], [], []>} : vector<32x16xbf16>, vector<16x128xbf16>, vector<32x128xf32> -> vector<32x128xf32>
    %147 = vector.extract_strided_slice %146 {offsets = [0, 0], sizes = [16, 128], strides = [1, 1]} : vector<32x128xf32> to vector<16x128xf32>
    %148 = vector.extract_strided_slice %146 {offsets = [16, 0], sizes = [16, 128], strides = [1, 1]} : vector<32x128xf32> to vector<16x128xf32>
    %149 = vector.broadcast %142 : vector<16x1xf32> to vector<16x128xf32>
    %150 = arith.mulf %147, %149 : vector<16x128xf32>
    %151 = vector.broadcast %143 : vector<16x1xf32> to vector<16x128xf32>
    %152 = arith.mulf %148, %151 : vector<16x128xf32>
    %153 = arith.addf %150, %152 : vector<16x128xf32>
    %154 = vector.broadcast %143 : vector<16x1xf32> to vector<16x128xf32>
    %155 = arith.mulf %147, %154 : vector<16x128xf32>
    %156 = vector.broadcast %142 : vector<16x1xf32> to vector<16x128xf32>
    %157 = arith.mulf %148, %156 : vector<16x128xf32>
    %158 = arith.subf %155, %157 : vector<16x128xf32>
    %159 = tpu.concatenate %153, %158 in 0 : vector<16x128xf32>, vector<16x128xf32> -> vector<32x128xf32>
    %160 = arith.truncf %7 : vector<16x32xf32> to vector<16x32xbf16>
    %161 = arith.truncf %159 : vector<32x128xf32> to vector<32x128xbf16>
    %cst_46 = arith.constant dense<0.000000e+00> : vector<16x128xf32>
    %162 = tpu.matmul %160, %161, %cst_46 {dimension_numbers = #tpu.dot_dimension_numbers<[1], [0], [0], [1], [0, 0, 1, 1], [], []>} : vector<16x32xbf16>, vector<32x128xbf16>, vector<16x128xf32> -> vector<16x128xf32>
    %cst_47 = arith.constant 6.250000e-02 : f32
    %163 = vector.broadcast %cst_47 : f32 to vector<16x128xf32>
    %164 = arith.mulf %162, %163 : vector<16x128xf32>
    %165 = arith.truncf %164 : vector<16x128xf32> to vector<16x128xbf16>
    %c0_48 = arith.constant 0 : index
    %c0_49 = arith.constant 0 : index
    %166 = vector.load %arg7[%c0_48, %c0_49] : memref<128x128xbf16, #tpu.memory_space<vmem>>, vector<128x128xbf16>
    %cst_50 = arith.constant dense<0.000000e+00> : vector<16x128xf32>
    %167 = tpu.matmul %165, %166, %cst_50 {dimension_numbers = #tpu.dot_dimension_numbers<[1], [0], [0], [1], [0, 0, 1, 1], [], []>} : vector<16x128xbf16>, vector<128x128xbf16>, vector<16x128xf32> -> vector<16x128xf32>
    %c0_51 = arith.constant 0 : index
    %c0_52 = arith.constant 0 : index
    %168 = vector.load %arg8[%c0_51, %c0_52] : memref<1x128xf32, #tpu.memory_space<vmem>>, vector<1x128xf32>
    %169 = vector.broadcast %168 : vector<1x128xf32> to vector<16x128xf32>
    %170 = arith.addf %167, %169 : vector<16x128xf32>
    %c0_53 = arith.constant 0 : index
    %c0_54 = arith.constant 0 : index
    %c0_55 = arith.constant 0 : index
    %171 = vector.load %arg11[%c0_53, %c0_54, %c0_55] : memref<1x16x128xf32, #tpu.memory_space<vmem>>, vector<1x16x128xf32>
    %172 = vector.shape_cast %171 : vector<1x16x128xf32> to vector<16x128xf32>
    %173 = vector.shape_cast %170 : vector<16x128xf32> to vector<1x16x128xf32>
    tpu.vector_store %arg11[%c0_53, %c0_54, %c0_55], %173 {strides = array<i32>} : memref<1x16x128xf32, #tpu.memory_space<vmem>>, vector<1x16x128xf32>,
    return
  }
  func.func @transform_0(%arg0: i32) -> (i32, i32, i32) {
    %c0_i32 = arith.constant 0 : i32
    %c0_i32_0 = arith.constant 0 : i32
    %c0_i32_1 = arith.constant 0 : i32
    return %arg0, %c0_i32, %c0_i32_0 : i32, i32, i32
  }
  func.func @transform_1(%arg0: i32) -> (i32, i32, i32) {
    %c0_i32 = arith.constant 0 : i32
    %c0_i32_0 = arith.constant 0 : i32
    %c0_i32_1 = arith.constant 0 : i32
    return %arg0, %c0_i32, %c0_i32_0 : i32, i32, i32
  }
  func.func @transform_2(%arg0: i32) -> (i32, i32) {
    %c0_i32 = arith.constant 0 : i32
    %c0_i32_0 = arith.constant 0 : i32
    %c0_i32_1 = arith.constant 0 : i32
    return %c0_i32, %c0_i32_0 : i32, i32
  }
  func.func @transform_3(%arg0: i32) -> (i32, i32) {
    %c0_i32 = arith.constant 0 : i32
    %c0_i32_0 = arith.constant 0 : i32
    %c0_i32_1 = arith.constant 0 : i32
    return %c0_i32, %c0_i32_0 : i32, i32
  }
  func.func @transform_4(%arg0: i32) -> (i32, i32) {
    %c0_i32 = arith.constant 0 : i32
    %c0_i32_0 = arith.constant 0 : i32
    %c0_i32_1 = arith.constant 0 : i32
    return %c0_i32, %c0_i32_0 : i32, i32
  }
  func.func @transform_5(%arg0: i32) -> (i32, i32) {
    %c0_i32 = arith.constant 0 : i32
    %c0_i32_0 = arith.constant 0 : i32
    %c0_i32_1 = arith.constant 0 : i32
    return %c0_i32, %c0_i32_0 : i32, i32
  }
  func.func @transform_6(%arg0: i32) -> (i32, i32) {
    %c0_i32 = arith.constant 0 : i32
    %c0_i32_0 = arith.constant 0 : i32
    %c0_i32_1 = arith.constant 0 : i32
    return %c0_i32, %c0_i32_0 : i32, i32
  }
  func.func @transform_7(%arg0: i32) -> (i32, i32) {
    %c0_i32 = arith.constant 0 : i32
    %c0_i32_0 = arith.constant 0 : i32
    %c0_i32_1 = arith.constant 0 : i32
    return %c0_i32, %c0_i32_0 : i32, i32
  }
  func.func @transform_8(%arg0: i32) -> (i32, i32) {
    %c0_i32 = arith.constant 0 : i32
    %c0_i32_0 = arith.constant 0 : i32
    %c0_i32_1 = arith.constant 0 : i32
    return %c0_i32, %c0_i32_0 : i32, i32
  }
  func.func @transform_9(%arg0: i32) -> (i32, i32) {
    %c0_i32 = arith.constant 0 : i32
    %c0_i32_0 = arith.constant 0 : i32
    %c0_i32_1 = arith.constant 0 : i32
    return %c0_i32, %c0_i32_0 : i32, i32
  }
  func.func @transform_10(%arg0: i32) -> (i32, i32, i32) {
    %c0_i32 = arith.constant 0 : i32
    %c0_i32_0 = arith.constant 0 : i32
    %c0_i32_1 = arith.constant 0 : i32
    return %arg0, %c0_i32, %c0_i32_0 : i32, i32, i32
  }
}

</mosaic_0001>

<bundles_post_ra>
// kernel: tpu_custom_call.1
= control target key start
LH: loop header
LB: loop body
LE: loop exit
PB: predicated region body
PF: predicated region fallthrough
CT: control target
= control target key end

     0   :  { %s2472_s0 = inlined_call_operand.vmem [shape: f32[2,16,128], index: 0, kind: input, shape index: {}]   ;;  %s2473_s1 = inlined_call_operand.hbm [shape: f32[2,16,128], index: 1, kind: input, shape index: {}]   ;;  %s2474_s2 = inlined_call_operand.hbm [shape: bf16[128,128], index: 2, kind: input, shape index: {}]   ;;  %s2475_s3 = inlined_call_operand.hbm [shape: f32[1,128], index: 3, kind: input, shape index: {}]   ;;  %s2476_s4 = inlined_call_operand.hbm [shape: bf16[128,256], index: 4, kind: input, shape index: {}]   ;;  %s2477_s5 = inlined_call_operand.vmem [shape: f32[1,256], index: 5, kind: input, shape index: {}]   ;;  %s2478_s6 = inlined_call_operand.hbm [shape: bf16[128,128], index: 6, kind: input, shape index: {}]   ;;  %s2479_s7 = inlined_call_operand.vmem [shape: f32[1,128], index: 7, kind: input, shape index: {}]   ;;  %s2480_s8 = inlined_call_operand.vmem [shape: f32[32,16], index: 8, kind: input, shape index: {}]   ;;  %s2481_s9 = inlined_call_operand.vmem [shape: f32[16,32], index: 9, kind: input, shape index: {}]   ;;  %s2482_s10 = inlined_call_operand.hbm [shape: f32[2,16,128], index: 10, kind: output, shape index: {}]  }
   0x1   :  { %2486 = sst [smem:[#allocation17_spill]] %s2474_s2 }
   0x2   :  { %2487 = sst [smem:[#allocation18_spill]] %s2475_s3 }
   0x3   :  { %2488 = sst [smem:[#allocation19_spill]] %s2476_s4 }
   0x4   :  { %15 = vsyncpa [#allocation3], 0 }
   0x5   :  { %17 = vsyncpa [#allocation3 + $0x1], 0 }
   0x6   :  { %18 = vsyncpa [#allocation6], 0 }
   0x7   :  { %19 = vsyncpa [#allocation9], 0 }
   0x8   :  { %20 = vsyncpa [#allocation4], 0 }
   0x9   :  { %22 = vsyncpa [#allocation4 + $0x1], 0  ;;  %s2071_s13 = smov 0   ;;  %s2073_s14 = smov 0  }
   0xa   :  { %s2075_s15 = smov 0   ;;  %s2077_s16 = smov 0  }
   0xb LB: > { %s2092_s17 = sadd.s32 4294967295, %s2003_s16   ;;  %s1448_s18 = sadd.s32 4294967294, %s2003_s16   ;;  %s2003_s16 = sphi %s2077_s16, %s2522_s16   ;;  %s1999_s15 = sphi %s2075_s15, %s2521_s15   ;;  %s1995_s14 = sphi %s2073_s14, %s2520_s14   ;;  %s1991_s13 = sphi %s2071_s13, %s2519_s13  }
   0xc   : > { %p74_p0 = scmp.ne.s32.totalorder %s1995_s14, %s1991_s13  ;;  %p75_p1 = scmp.eq.s32.totalorder %s2092_s17, 0 }
   0xd   : > { %p266_p2 = scmp.eq.s32.totalorder %s2092_s17, 1  ;;  %p272_p3 = scmp.eq.s32.totalorder %s1448_s18, 1 }
   0xe   : > { %p2101_p4 = por %p75_p1, %p74_p0  ;;  %p1449_p5 = scmp.ge.s32.totalorder %s2003_s16, 1 }
   0xf   : > { %p2106_p6 = por %p272_p3, %p74_p0  ;;  %p279_p7 = scmp.lt.s32.totalorder %s2003_s16, 3 }
  0x10   : > { %s2492_s2 = sld [smem:[#allocation17_spill]]  ;;  %s2005_s25 = smov [#allocation5]  }
  0x11   : > { %s2490_s20 = scalar_select %p2106_p6, 1, 0 }
  0x12   : > { %p2114_p8 = pnand %p1449_p5, %p279_p7  ;;  %s292_s26 = sshll.u32 %s2005_s25, 4  ;;  %s293_s26 = int_to_ptr.vmem [resolvable:$true] %s292_s26 }
  0x13   : > { %2491 = sst [smem:[#allocation16_spill]] %s2490_s20  ;;  %s2006_s11 = smov 64  }
  0x14   : > { %p1694_p9 = pneg %p2114_p8  ;;  %s2495_s4 = sld [smem:[#allocation19_spill]] }
  0x15   : > { %s2007_s12 = smov 4   ;;  %s2008_s18 = smov [#allocation8]  }
  0x16   : > { %s290_s23 = sshll.u32 %s2492_s2, 4  ;;  %p2122_p10 = pnand %p1694_p9, %p75_p1  ;;  %s291_s23 = int_to_ptr.hbm [resolvable:$true] %s290_s23 }
  0x17   : > { %s318_s21 = sshll.u32 %s2008_s18, 4  ;;  %s2484_s22 = smov 128   ;;  %s319_s21 = int_to_ptr.vmem [resolvable:$true] %s318_s21 }
  0x18   : > { %1697 = dma.hbm_to_vmem [thread:$0]  (!%p2122_p10), %s291_s23, 1024, %s293_s26, [#allocation6], %s2006_s11, %s2006_s11, %s2007_s12  }
  0x19   : > { %s2485_s25 = smov 8   ;;  %s2496_s3 = sld [smem:[#allocation18_spill]] }
  0x1a   : > { %s316_s30 = sshll.u32 %s2495_s4, 4  ;;  %s2011_s26 = smov [#allocation7]   ;;  %s317_s30 = int_to_ptr.hbm [resolvable:$true] %s316_s30 }
  0x1b   : > { %1703 = dma.hbm_to_vmem [thread:$0]  (!%p2122_p10), %s317_s30, 2048, %s319_s21, [#allocation9], %s2484_s22, %s2484_s22, %s2485_s25  }
  0x1c   : > { %s307_s18 = sshll.u32 %s2011_s26, 4  ;;  %s333_s20 = sshll.u32 %s2478_s6, 4  ;;  %s308_s18 = int_to_ptr.vmem [resolvable:$true] %s307_s18  ;;  %s334_s20 = int_to_ptr.hbm [resolvable:$true] %s333_s20 }
  0x1d   : > { %s2012_s30 = smov [#allocation10]   ;;  %s2148_s28 = sadd.s32 1, %s2003_s16  }
  0x1e   : > { %s335_s21 = sshll.u32 %s2012_s30, 4  ;;  %s61_s29 = sadd.s32 1, %s1999_s15  ;;  %s336_s21 = int_to_ptr.vmem [resolvable:$true] %s335_s21 }
  0x1f   : > { %s305_s23 = sshll.u32 %s2496_s3, 4  ;;  %s58_s26 = ssub.s32 %s2003_s16, %s2148_s28  ;;  %s306_s23 = int_to_ptr.hbm [resolvable:$true] %s305_s23 }
  0x20   : > { %1700 = dma.hbm_to_vmem [thread:$0]  (!%p2122_p10), %s306_s23, 16, %s308_s18, [#allocation6]  }
  0x21   : > { %1706 = dma.hbm_to_vmem [thread:$0]  (!%p2122_p10), %s334_s20, 1024, %s336_s21, [#allocation9], %s2006_s11, %s2006_s11, %s2007_s12  }
  0x22   : > { %p68_p12 = scmp.ne.s32.totalorder %s1999_s15, %s1995_s14  ;;  %p59_p13 = scmp.eq.s32.totalorder %s58_s26, 0 }
  0x23   : > { %p69_p0 = scmp.eq.s32.totalorder %s2003_s16, 0  ;;  %p1719_p5 = scmp.lt.s32.totalorder %s2003_s16, 2 }
  0x24   : > { %p2158_p3 = por %p266_p2, %p68_p12  ;;  %s366_s23 = sand.u32 1, %s1999_s15  }
  0x25   : > { %s2164_s4 = scalar_select %p59_p13, %s1999_s15, %s61_s29  }
  0x26   : > { %p70_p7 = por %p69_p0, %p68_p12  ;;  %s1455_s27 = sshll.u32 %s366_s23, 4 }
  0x27   : > { %s1617_s20 = sshll.u32 %s2003_s16, 4  ;;  %s370_s30 = scalar_lea.vmem [#allocation2], %s1455_s27 }
  0x28   : > { %s375_s18 = scalar_lea.hbm %s2473_s1, %s1617_s20  ;;  %s378_s21 = sshll.u32 %s370_s30, 4  ;;  %s379_s21 = int_to_ptr.vmem [resolvable:$true] %s378_s21 }
  0x29   : > { %s376_s26 = sshll.u32 %s375_s18, 4  ;;  %p2171_p2 = pnand %p1719_p5, %p70_p7  ;;  %s377_s26 = int_to_ptr.hbm [resolvable:$true] %s376_s26 }
  0x2a   : > { %s367_s29 = scalar_lea.sflag [#allocation3], %s366_s23  ;;  %s1899_s25 = sshra.s32 %s377_s26, 4  ;;  %s1900_s25 = int_to_ptr.hbm [resolvable:$true] %s1899_s25 }
  0x2b   : > { %s1901_s3 = scalar_lea.hbm %s1900_s25, 16  ;;  %p1903_p10 = pneg %p2171_p2 }
  0x2c   : > { %p1902_p9 = scmp.ne.s32.totalorder %s1900_s25, %s1901_s3  ;;  %s1906_s11 = scalar_lea.hbm %s2473_s1, 32 }
  0x2d   : > { %p1907_p0 = scmp.lt.s32.totalorder %s1900_s25, %s2473_s1  ;;  %p1908_p5 = scmp.lt.s32.totalorder %s1906_s11, %s1901_s3 }
  0x2e   : > { %p1904_p12 = pnand %p1903_p10, %p1902_p9 }
  0x2f   : > { %p1909_p7 = por %p1908_p5, %p1907_p0 }
  0x30   : > { %p1905_p13 = pneg %p1904_p12 }
  0x32   : > { %p1910_p11 = pnand %p1909_p7, %p1905_p13 }
  0x34   : > { %1913 = shalt.err (!%p1910_p11)
}
  0x35   : > { %s2499_s23 = smov 8   ;;  %s2500_s30 = smov 128  }
  0x36   : > { %1710 = dma.hbm_to_vmem [thread:$0]  (!%p2171_p2), %s377_s26, 256, %s379_s21, %s367_s29, %s2500_s30, %s2500_s30, %s2499_s23  }
  0x37   : > { %390 = sbr.rel (%p2114_p8) target bundleno = 3923 (0xf53), region = 60  ;;  %s2191_s20 = sand.u32 (!%p2114_p8), 1, %s1995_s14  }
  0x38   : > { %s1459_s3 = sshll.u32 (!%p2114_p8), %s2191_s20, 4  ;;  %s393_s25 = scalar_lea.sflag (!%p2114_p8), [#allocation3], %s2191_s20 }
  0x39   : > { %s2197_s27 = scalar_lea.vmem (!%p2114_p8), [#allocation2], %s1459_s3 }
  0x3c   : > { %1974 = dma.done.wait (%p2101_p4), %s393_s25, 256  }
  0x3d   : > { %1976 = vsyncadd (%p2101_p4), %s393_s25, 4294967040 }
  0x3e   : > { %1978 = dma.done.wait (%p75_p1), [#allocation6], 1040  }
  0x3f   : > { %1980 = vsyncadd (%p75_p1), [#allocation6], 4294966256 }
  0x40   : > { %1982 = dma.done.wait (%p75_p1), [#allocation9], 3072  }
  0x41   : > { %1984 = vsyncadd (%p75_p1), [#allocation9], 4294964224  ;;  %v1626_v0 = vld [vmem:[#allocation5 + $0x38] sm:$0xff]  ;;  %v1557_v1 = vld [vmem:[#allocation8 + $0x70] sm:$0xf]  ;;  %p459_p1 = scmp.lt.s32.totalorder %s2092_s17, 1 }
  0x42   : > { %v1642_v2 = vld [vmem:[#allocation8 + $0x74] sm:$0xf0]  ;;  %v1549_v3 = vld [vmem:[#allocation8 + $0x60] sm:$0xf]  ;;  %545 = vmatpush.bf16.msra.mxu0 %v1626_v0  ;;  %v1625_v4 = vld [vmem:[#allocation5 + $0x30] sm:$0xff]  ;;  %vm689_vm0 = vcmask 130048  }
  0x43   : > { %v1558_v5 = vor.u32 %v1642_v2, %v1557_v1  ;;  %v1640_v6 = vld [vmem:[#allocation8 + $0x64] sm:$0xf0]  ;;  %v1541_v8 = vld [vmem:[#allocation8 + $0x50] sm:$0xf]  ;;  %v1638_v9 = vld [vmem:[#allocation8 + $0x54] sm:$0xf0] }
  0x44   : > { %v1550_v7 = vor.u32 %v1640_v6, %v1549_v3  ;;  %v1624_v10 = vld [vmem:[#allocation5 + $0x28] sm:$0xff]  ;;  %v1542_v11 = vor.u32 %v1638_v9, %v1541_v8  ;;  %v1533_v12 = vld [vmem:[#allocation8 + $0x40] sm:$0xf]  ;;  %v1525_v16 = vld [vmem:[#allocation8 + $0x30] sm:$0xf]  ;;  %s460_s19 = scalar_select %p459_p1, %s2092_s17, 1 }
  0x45   : > { %661 = vmatpush.bf16.msra.mxu1 %v1558_v5  ;;  %v1636_v13 = vld [vmem:[#allocation8 + $0x44] sm:$0xf0]  ;;  %v1623_v14 = vld [vmem:[#allocation5 + $0x20] sm:$0xff]  ;;  %v1634_v17 = vld [vmem:[#allocation8 + $0x34] sm:$0xf0]  ;;  %vm780_vm1 = vcmask 261120  }
  0x46   : > { %546 = vmatpush.bf16.msra.mxu0 %v1625_v4  ;;  %v1534_v15 = vor.u32 %v1636_v13, %v1533_v12  ;;  %v1622_v18 = vld [vmem:[#allocation5 + $0x18] sm:$0xff]  ;;  %v1526_v19 = vor.u32 %v1634_v17, %v1525_v16  ;;  %v1517_v20 = vld [vmem:[#allocation8 + $0x20] sm:$0xf]  ;;  %v1632_v21 = vld [vmem:[#allocation8 + $0x24] sm:$0xf0]  ;;  %s1618_s24 = sshll.u32 %s460_s19, 4 }
  0x47   : > { %v1621_v22 = vld [vmem:[#allocation5 + $0x10] sm:$0xff]  ;;  %v1518_v23 = vor.u32 %v1632_v21, %v1517_v20  ;;  %v1630_v25 = vld [vmem:[#allocation8 + $0x14] sm:$0xf0]  ;;  %v1620_v26 = vld [vmem:[#allocation5 + $0x8] sm:$0xff]  ;;  %s463_s26 = scalar_lea.vmem %s2472_s0, %s1618_s24  ;;  %vm817_vm2 = vcmask 7168  }
  0x48   : > { %v1509_v24 = vld [vmem:[#allocation8 + $0x10] sm:$0xf]  ;;  %v1501_v28 = vld [vmem:[#allocation8] sm:$0xf]  ;;  %v1628_v29 = vld [vmem:[#allocation8 + $0x4] sm:$0xf0] }
  0x49   : > { %662 = vmatpush.bf16.msra.mxu1 %v1550_v7  ;;  %v1510_v27 = vor.u32 %v1630_v25, %v1509_v24  ;;  %v1619_v30 = vld [vmem:[#allocation5] sm:$0xff]  ;;  %v466_v32 = vld [vmem:[%s463_s26 + $0x8] sm:$0xff]  ;;  %v1502_v33 = vor.u32 %v1628_v29, %v1501_v28  ;;  %v2244_v51 = vld [vmem:[%s2480_s8 + $0x10] sm:$0xff] }
  0x4a   : > { %547 = vmatpush.bf16.msra.mxu0 %v1624_v10  ;;  %v465_v31 = vld [vmem:[%s463_s26] sm:$0xff]  ;;  %v469_v35 = vld [vmem:[%s2197_s27 + $0x8] sm:$0xff] }
  0x4b   : > { %v468_v34 = vld [vmem:[%s2197_s27] sm:$0xff]  ;;  %v467_v36 = vpack.c.bf16 %v466_v32, %v465_v31  ;;  %v2237_v50 = vld [vmem:[%s2480_s8 + $0x8] sm:$0xff]  ;;  %v2251_v52 = vld [vmem:[%s2480_s8 + $0x18] sm:$0xff] }
  0x4c   : > { %v2218_v37 = vpack.c.bf16 %v469_v35, %v468_v34  ;;  %v2224_v40 = vld [vmem:[%s2477_s5] sm:$0x3]  ;;  %v2271_v10 = vld [vmem:[%s2481_s9 + $0x8] sm:$0xff] }
  0x4d   : > { %663 = vmatpush.bf16.msra.mxu1 %v1542_v11  ;;  %v1771_v41 = vld [vmem:[#allocation7] ss:$0 sm:$0xff]  ;;  %v577_v42 = vperm.slane %v2224_v40, 0 }
  0x4e   : > { %548 = vmatpush.bf16.msra.mxu0 %v1623_v14  ;;  %v2230_v48 = vld [vmem:[%s2480_s8] sm:$0xff] }
  0x4f   : > { %v2266_v9 = vld [vmem:[%s2481_s9] sm:$0xff] }
  0x50   : > { %v1202_v11 = vpack.c.bf16 %v2271_v10, %v2266_v9 }
  0x51   : > { %664 = vmatpush.bf16.msra.mxu1 %v1534_v15 }
  0x52   : > { %549 = vmatpush.bf16.msra.mxu0 %v1622_v18 }
  0x55   : > { %665 = vmatpush.bf16.msra.mxu1 %v1526_v19 }
  0x56   : > { %550 = vmatpush.bf16.msra.mxu0 %v1621_v22 }
  0x59   : > { %666 = vmatpush.bf16.msra.mxu1 %v1518_v23 }
  0x5a   : > { %551 = vmatpush.bf16.msra.mxu0 %v1620_v26 }
  0x5d   : > { %667 = vmatpush.bf16.msra.mxu1 %v1510_v27 }
  0x5e   : > { %552 = vmatpush.bf16.msra.mxu0 %v1619_v30  ;;  %v812_v30 = vlaneseq }
  0x60   : > { %v2287_v31 = vshrl.u32 %v812_v30, 7 }
  0x61   : > { %668 = vmatpush.bf16.msra.mxu1 %v1502_v33  ;;  %553 = vmatmul.bf16.vlgmr.msra.gmra.mxu0 %v467_v36 }
  0x62   : > { %v2290_v32 = vadd.s32 8, %v2287_v31 }
  0x64   : > { %669 = vmatmul.bf16.vlgmr.msra.gmra.mxu1 %v2218_v37 }
  0xde   : > { %v554_v38 = vpop.f32.mrf.mxu0 }
  0xdf   : > { %v555_v46 = vadd.f32 %v1771_v41, %v554_v38 }
  0xe1   : > { %v670_v39 = vpop.f32.mrf.mxu1 }
  0xe2   : > { %v671_v49 = vadd.f32 %v670_v39, %v577_v42 }
  0xe6   : > { %v556_v43 = vpop.f32.mrf.mxu0 }
  0xe7   : > { %v557_v44 = vadd.f32 %v1771_v41, %v556_v43 }
  0xe9   : > { %v672_v45 = vpop.f32.mrf.mxu1  ;;  %716 = vmatpush.msra.mxu3 %v557_v44 }
  0xea   : > { %v673_v47 = vadd.f32 %v672_v45, %v577_v42 }
  0xeb   : > { %717 = vmatpush.msra.mxu3 %v555_v46 }
  0xec   : > { %1563 = vmatmul.msk.f32.vlgmr.msra.gmra.mxu3 %vm689_vm0, %v2230_v48 }
  0xed   : > { %745 = vmatpush.msrb.mxu3 %v673_v47 }
  0xef   : > { %746 = vmatpush.msrb.mxu3 %v671_v49 }
  0xf4   : > { %1564 = vmatmul.msk.f32.gmra.mxu3 %vm689_vm0, %v2237_v50 }
  0xfc   : > { %1565 = vmatmul.msk.f32.gmra.mxu3 %vm689_vm0, %v2244_v51 }
 0x104   : > { %1566 = vmatmul.msk.f32.gmra.mxu3 %vm689_vm0, %v2251_v52 }
 0x10c   : > { %1567 = vmatmul.msk.f32.vlgmr.msrb.gmra.mxu3 %vm689_vm0, %v2230_v48 }
 0x114   : > { %1568 = vmatmul.msk.f32.gmra.mxu3 %vm689_vm0, %v2237_v50 }
 0x11c   : > { %1569 = vmatmul.msk.f32.gmra.mxu3 %vm689_vm0, %v2244_v51 }
 0x124   : > { %1570 = vmatmul.msk.f32.gmra.mxu3 %vm689_vm0, %v2251_v52 }
 0x16f   : > { %v719_v53 = vpop.f32.mrf.mxu3 }
 0x177   : > { %v722_v54 = vpop.f32.mrf.mxu3 }
 0x17f   : > { %v725_v55 = vpop.f32.mrf.mxu3 }
 0x187   : > { %v728_v56 = vpop.f32.mrf.mxu3 }
 0x18f   : > { %v748_v57 = vpop.f32.mrf.mxu3 }
 0x190   : > { %v760_v5 = vmul.f32 %v748_v57, %v719_v53  ;;  %v768_v6 = vmul.f32 %v748_v57, %v725_v55 }
 0x197   : > { %v751_v58 = vpop.f32.mrf.mxu3 }
 0x198   : > { %v761_v61 = vmul.f32 %v751_v58, %v722_v54  ;;  %v769_v62 = vmul.f32 %v751_v58, %v728_v56 }
 0x19f   : > { %v754_v59 = vpop.f32.mrf.mxu3 }
 0x1a0   : > { %v762_v3 = vmul.f32 %v754_v59, %v725_v55  ;;  %v766_v4 = vmul.f32 %v754_v59, %v719_v53 }
 0x1a2   : > { %v770_v7 = vsub.f32 %v766_v4, %v768_v6  ;;  %v764_v8 = vadd.f32 %v762_v3, %v760_v5 }
 0x1a7   : > { %v757_v60 = vpop.f32.mrf.mxu3 }
 0x1a8   : > { %v763_v63 = vmul.f32 %v757_v60, %v728_v56  ;;  %v767_v0 = vmul.f32 %v757_v60, %v722_v54 }
 0x1aa   : > { %v771_v1 = vsub.f32 %v767_v0, %v769_v62  ;;  %v765_v2 = vadd.f32 %v763_v63, %v761_v61 }
 0x1ac   : > { %778 = vadd.xlane.f32.xlu0 %v771_v1  ;;  %774 = vadd.xlane.f32.xlu1 %v765_v2 }
 0x1b4   : > { %776 = vadd.xlane.f32.xlu0 %v770_v7  ;;  %772 = vadd.xlane.f32.xlu1 %v764_v8 }
 0x21f   : > { %v779_v12 = vpop.xlane.xlu0 %778  ;;  %v775_v13 = vpop.xlane.xlu1 %774 }
 0x220   : > { %799 = vmatpush.msrb.mxu0 %v779_v12 }
 0x227   : > { %v777_v14 = vpop.xlane.xlu0 %776  ;;  %v773_v15 = vpop.xlane.xlu1 %772 }
 0x228   : > { %800 = vmatpush.msrb.mxu0 %v777_v14 }
 0x22a   : > { %801 = vmatpush.msrb.mxu0 %v775_v13 }
 0x22c   : > { %802 = vmatpush.msrb.mxu0 %v773_v15 }
 0x22d   : > { %1571 = vmatmul.msk.f32.vlgmr.msrb.gmra.mxu0 %vm780_vm1, %v2266_v9  ;;  %v1772_v9 = vld [vmem:[%s2479_s7] ss:$0 sm:$0xff] }
 0x235   : > { %1572 = vmatmul.msk.f32.gmra.mxu0 %vm780_vm1, %v2271_v10 }
 0x2aa   : > { %v804_v16 = vpop.f32.mrf.mxu0 }
 0x2ab   : > { %v2279_v17 = vmul.f32 0.00048828125, %v804_v16 }
 0x2ad   : > { %v818_v20 = vsel %vm817_vm2, %v2279_v17, -inf }
 0x2b2   : > { %v807_v18 = vpop.f32.mrf.mxu0 }
 0x2b3   : > { %v2281_v19 = vmul.f32 0.00048828125, %v807_v18 }
 0x2b5   : > { %v819_v21 = vsel %vm817_vm2, %v2281_v19, -inf }
 0x2b6   : > { %v820_v22 = vmax.f32 %v818_v20, %v819_v21 }
 0x2b8   : > { %821 = vmax.xlane.f32.xlu2 %v820_v22 }
 0x32b   : > { %v822_v23 = vpop.xlane.xlu2 %821 }
 0x32c   : > { %v823_v24 = vrot.slane %v822_v23, 4 }
 0x32e   : > { %v824_v25 = vmax.f32 %v822_v23, %v823_v24 }
 0x330   : > { %v825_v26 = vrot.slane %v824_v25, 2 }
 0x332   : > { %v826_v27 = vmax.f32 %v824_v25, %v825_v26 }
 0x334   : > { %v827_v28 = vrot.slane %v826_v27, 1 }
 0x336   : > { %v828_v29 = vmax.f32 %v826_v27, %v827_v28 }
 0x338   : > { %1652 = vpush %v828_v29 }
 0x369   : > { %s1653_s11 = spop %1652 }
 0x36a   : > { %v2292_v33 = vstv %s1653_s11  ;;  %s1651_s11 = sshll.u32 %s2092_s17, 4 }
 0x36b   : > { %vm831_vm3 = vcmp.eq.f32.partialorder %v2279_v17, %v2292_v33  ;;  %vm832_vm4 = vcmp.eq.f32.partialorder %v2281_v19, %v2292_v33 }
 0x36c   : > { %v833_v34 = vsel %vm831_vm3, %v2287_v31, 16  ;;  %v834_v35 = vsel %vm832_vm4, %v2290_v32, 16 }
 0x36d   : > { %v835_v36 = vsel %vm817_vm2, %v833_v34, 2147483647  ;;  %v836_v38 = vsel %vm817_vm2, %v834_v35, 2147483647 }
 0x36e   : > { %vm837_vm5 = vcmp.lt.s32.totalorder %v835_v36, %v836_v38 }
 0x36f   : > { %v838_v39 = vsel %vm837_vm5, %v835_v36, %v836_v38 }
 0x370   : > { %v840_v41 = vshra.s32 %v838_v39, 16  ;;  %v839_v43 = vand.u32 65535, %v838_v39 }
 0x372   : > { %v842_v42 = vcvt.s32.f32 %v840_v41  ;;  %v841_v45 = vcvt.s32.f32 %v839_v43 }
 0x374   : > { %843 = vmin.xlane.f32.xlu2 %v842_v42 }
 0x3e7   : > { %v844_v44 = vpop.xlane.xlu2 %843 }
 0x3e8   : > { %vm845_vm6 = vcmp.eq.f32.partialorder %v842_v42, %v844_v44  ;;  %v850_v47 = vcvt.f32.s32 %v844_v44 }
 0x3e9   : > { %v846_v46 = vsel %vm845_vm6, %v841_v45, inf }
 0x3ea   : > { %847 = vmin.xlane.f32.xlu0 %v846_v46  ;;  %v851_v53 = vshll.u32 %v850_v47, 16 }
 0x45d   : > { %v848_v49 = vpop.xlane.xlu0 %847 }
 0x45e   : > { %v849_v54 = vcvt.f32.s32 %v848_v49 }
 0x460   : > { %v852_v55 = vadd.s32 %v851_v53, %v849_v54 }
 0x462   : > { %v853_v56 = vrot.slane %v852_v55, 4 }
 0x464   : > { %vm854_vm7 = vcmp.lt.s32.totalorder %v852_v55, %v853_v56 }
 0x465   : > { %v855_v57 = vsel %vm854_vm7, %v852_v55, %v853_v56 }
 0x466   : > { %v856_v58 = vrot.slane %v855_v57, 2 }
 0x468   : > { %vm857_vm8 = vcmp.lt.s32.totalorder %v855_v57, %v856_v58 }
 0x469   : > { %v858_v59 = vsel %vm857_vm8, %v855_v57, %v856_v58 }
 0x46a   : > { %v859_v60 = vrot.slane %v858_v59, 1 }
 0x46c   : > { %vm860_vm9 = vcmp.lt.s32.totalorder %v858_v59, %v859_v60 }
 0x46d   : > { %v861_v61 = vsel %vm860_vm9, %v858_v59, %v859_v60 }
 0x46e   : > { %1654 = vpush %v861_v61 }
 0x49f   : > { %s1655_s12 = spop %1654 }
 0x4a0   : > { %v863_v62 = vstv %s1655_s12 }
 0x4a1   : > { %vm2303_vm10 = vcmp.eq.s32.totalorder %v2287_v31, %v863_v62  ;;  %vm2308_vm11 = vcmp.eq.s32.totalorder %v2290_v32, %v863_v62 }
 0x4a2   : > { %v868_v1 = vsel %vm2303_vm10, -1e+30, %v2279_v17  ;;  %v869_v2 = vsel %vm2308_vm11, -1e+30, %v2281_v19 }
 0x4a3   : > { %v870_v3 = vsel %vm817_vm2, %v868_v1, -inf  ;;  %v871_v4 = vsel %vm817_vm2, %v869_v2, -inf }
 0x4a4   : > { %v872_v5 = vmax.f32 %v870_v3, %v871_v4 }
 0x4a6   : > { %873 = vmax.xlane.f32.xlu1 %v872_v5 }
 0x519   : > { %v874_v6 = vpop.xlane.xlu1 %873 }
 0x51a   : > { %v875_v7 = vrot.slane %v874_v6, 4 }
 0x51c   : > { %v876_v8 = vmax.f32 %v874_v6, %v875_v7 }
 0x51e   : > { %v877_v12 = vrot.slane %v876_v8, 2 }
 0x520   : > { %v878_v13 = vmax.f32 %v876_v8, %v877_v12 }
 0x522   : > { %v879_v14 = vrot.slane %v878_v13, 1 }
 0x524   : > { %v880_v15 = vmax.f32 %v878_v13, %v879_v14 }
 0x526   : > { %1656 = vpush %v880_v15 }
 0x557   : > { %s1657_s18 = spop %1656 }
 0x558   : > { %v882_v16 = vstv %s1657_s18 }
 0x559   : > { %vm883_vm12 = vcmp.eq.f32.partialorder %v868_v1, %v882_v16  ;;  %vm884_vm13 = vcmp.eq.f32.partialorder %v869_v2, %v882_v16 }
 0x55a   : > { %v885_v18 = vsel %vm883_vm12, %v2287_v31, 16  ;;  %v886_v20 = vsel %vm884_vm13, %v2290_v32, 16 }
 0x55b   : > { %v887_v21 = vsel %vm817_vm2, %v885_v18, 2147483647  ;;  %v888_v22 = vsel %vm817_vm2, %v886_v20, 2147483647 }
 0x55c   : > { %vm889_vm14 = vcmp.lt.s32.totalorder %v887_v21, %v888_v22 }
 0x55d   : > { %v890_v23 = vsel %vm889_vm14, %v887_v21, %v888_v22 }
 0x55e   : > { %v892_v24 = vshra.s32 %v890_v23, 16  ;;  %v891_v26 = vand.u32 65535, %v890_v23 }
 0x560   : > { %v894_v25 = vcvt.s32.f32 %v892_v24  ;;  %v893_v28 = vcvt.s32.f32 %v891_v26 }
 0x562   : > { %895 = vmin.xlane.f32.xlu2 %v894_v25 }
 0x5d5   : > { %v896_v27 = vpop.xlane.xlu2 %895 }
 0x5d6   : > { %vm897_vm15 = vcmp.eq.f32.partialorder %v894_v25, %v896_v27  ;;  %v902_v30 = vcvt.f32.s32 %v896_v27 }
 0x5d7   : > { %v898_v29 = vsel %vm897_vm15, %v893_v28, inf }
 0x5d8   : > { %899 = vmin.xlane.f32.xlu0 %v898_v29  ;;  %v903_v35 = vshll.u32 %v902_v30, 16 }
 0x64b   : > { %v900_v34 = vpop.xlane.xlu0 %899 }
 0x64c   : > { %v901_v36 = vcvt.f32.s32 %v900_v34 }
 0x64e   : > { %v904_v38 = vadd.s32 %v903_v35, %v901_v36  ;;  %v1631_v35 = vld [vmem:[#allocation8 + $0x24] sm:$0xf] }
 0x650   : > { %v905_v39 = vrot.slane %v904_v38, 4 }
 0x652   : > { %vm906_vm3 = vcmp.lt.s32.totalorder %v904_v38, %v905_v39 }
 0x653   : > { %v907_v41 = vsel %vm906_vm3, %v904_v38, %v905_v39  ;;  %v1627_v39 = vld [vmem:[#allocation8 + $0x4] sm:$0xf] }
 0x654   : > { %v908_v42 = vrot.slane %v907_v41, 2 }
 0x656   : > { %vm909_vm4 = vcmp.lt.s32.totalorder %v907_v41, %v908_v42 }
 0x657   : > { %v910_v43 = vsel %vm909_vm4, %v907_v41, %v908_v42 }
 0x658   : > { %v911_v44 = vrot.slane %v910_v43, 1 }
 0x65a   : > { %vm912_vm5 = vcmp.lt.s32.totalorder %v910_v43, %v911_v44 }
 0x65b   : > { %v913_v45 = vsel %vm912_vm5, %v910_v43, %v911_v44 }
 0x65c   : > { %1658 = vpush %v913_v45 }
 0x68d   : > { %s1659_s23 = spop %1658 }
 0x68e   : > { %v915_v46 = vstv %s1659_s23  ;;  %s1321_s23 = scalar_lea.hbm %s2482_s10, %s1651_s11 }
 0x68f   : > { %vm2325_vm6 = vcmp.eq.s32.totalorder %v2287_v31, %v915_v46  ;;  %vm2330_vm7 = vcmp.eq.s32.totalorder %v2290_v32, %v915_v46 }
 0x690   : > { %v920_v53 = vsel %vm2325_vm6, -1e+30, %v868_v1  ;;  %v921_v54 = vsel %vm2330_vm7, -1e+30, %v869_v2  ;;  %vm918_vm4 = vmor %vm2303_vm10, %vm2325_vm6 }
 0x691   : > { %v922_v55 = vsel %vm817_vm2, %v920_v53, -inf  ;;  %v923_v56 = vsel %vm817_vm2, %v921_v54, -inf  ;;  %vm919_vm5 = vmor %vm2308_vm11, %vm2330_vm7 }
 0x692   : > { %v924_v57 = vmax.f32 %v922_v55, %v923_v56 }
 0x694   : > { %925 = vmax.xlane.f32.xlu1 %v924_v57 }
 0x707   : > { %v926_v58 = vpop.xlane.xlu1 %925 }
 0x708   : > { %v927_v59 = vrot.slane %v926_v58, 4 }
 0x70a   : > { %v928_v60 = vmax.f32 %v926_v58, %v927_v59 }
 0x70c   : > { %v929_v61 = vrot.slane %v928_v60, 2 }
 0x70e   : > { %v930_v62 = vmax.f32 %v928_v60, %v929_v61 }
 0x710   : > { %v931_v3 = vrot.slane %v930_v62, 1 }
 0x712   : > { %v932_v4 = vmax.f32 %v930_v62, %v931_v3 }
 0x714   : > { %1660 = vpush %v932_v4 }
 0x745   : > { %s1661_s30 = spop %1660 }
 0x746   : > { %v934_v5 = vstv %s1661_s30  ;;  %s458_s30 = scalar_lea.vmem [#allocation11], %s1459_s3  ;;  %s1949_s3 = scalar_lea.hbm %s2482_s10, 32 }
 0x747   : > { %vm935_vm8 = vcmp.eq.f32.partialorder %v920_v53, %v934_v5  ;;  %vm936_vm9 = vcmp.eq.f32.partialorder %v921_v54, %v934_v5 }
 0x748   : > { %v937_v1 = vsel %vm935_vm8, %v2287_v31, 16  ;;  %v938_v2 = vsel %vm936_vm9, %v2290_v32, 16 }
 0x749   : > { %v939_v6 = vsel %vm817_vm2, %v937_v1, 2147483647  ;;  %v940_v7 = vsel %vm817_vm2, %v938_v2, 2147483647 }
 0x74a   : > { %vm941_vm12 = vcmp.lt.s32.totalorder %v939_v6, %v940_v7 }
 0x74b   : > { %v942_v8 = vsel %vm941_vm12, %v939_v6, %v940_v7 }
 0x74c   : > { %v944_v12 = vshra.s32 %v942_v8, 16  ;;  %v943_v14 = vand.u32 65535, %v942_v8 }
 0x74e   : > { %v946_v13 = vcvt.s32.f32 %v944_v12  ;;  %v945_v16 = vcvt.s32.f32 %v943_v14 }
 0x750   : > { %947 = vmin.xlane.f32.xlu2 %v946_v13 }
 0x7c3   : > { %v948_v15 = vpop.xlane.xlu2 %947 }
 0x7c4   : > { %vm949_vm13 = vcmp.eq.f32.partialorder %v946_v13, %v948_v15  ;;  %v954_v20 = vcvt.f32.s32 %v948_v15 }
 0x7c5   : > { %v950_v18 = vsel %vm949_vm13, %v945_v16, inf }
 0x7c6   : > { %951 = vmin.xlane.f32.xlu0 %v950_v18  ;;  %v955_v22 = vshll.u32 %v954_v20, 16 }
 0x839   : > { %v952_v21 = vpop.xlane.xlu0 %951 }
 0x83a   : > { %v953_v23 = vcvt.f32.s32 %v952_v21  ;;  %v1503_v21 = vld [vmem:[#allocation8 + $0x8] sm:$0xf0] }
 0x83c   : > { %v956_v24 = vadd.s32 %v955_v22, %v953_v23 }
 0x83e   : > { %v957_v25 = vrot.slane %v956_v24, 4 }
 0x840   : > { %vm958_vm14 = vcmp.lt.s32.totalorder %v956_v24, %v957_v25 }
 0x841   : > { %v959_v26 = vsel %vm958_vm14, %v956_v24, %v957_v25 }
 0x842   : > { %v960_v27 = vrot.slane %v959_v26, 2 }
 0x844   : > { %vm961_vm15 = vcmp.lt.s32.totalorder %v959_v26, %v960_v27 }
 0x845   : > { %v962_v28 = vsel %vm961_vm15, %v959_v26, %v960_v27 }
 0x846   : > { %v963_v29 = vrot.slane %v962_v28, 1 }
 0x848   : > { %vm964_vm3 = vcmp.lt.s32.totalorder %v962_v28, %v963_v29 }
 0x849   : > { %v965_v30 = vsel %vm964_vm3, %v962_v28, %v963_v29 }
 0x84a   : > { %1662 = vpush %v965_v30 }
 0x87b   : > { %s1663_s25 = spop %1662 }
 0x87c   : > { %v967_v34 = vstv %s1663_s25  ;;  %s1322_s25 = sshll.u32 %s458_s30, 4  ;;  %s1323_s25 = int_to_ptr.vmem [resolvable:$true] %s1322_s25 }
 0x87d   : > { %vm968_vm8 = vcmp.eq.s32.totalorder %v2287_v31, %v967_v34  ;;  %vm969_vm9 = vcmp.eq.s32.totalorder %v2290_v32, %v967_v34 }
 0x87e   : > { %vm2354_vm12 = vmor %vm918_vm4, %vm968_vm8  ;;  %v972_v36 = vsel %vm968_vm8, -1e+30, %v920_v53  ;;  %v973_v38 = vsel %vm969_vm9, -1e+30, %v921_v54 }
 0x87f   : > { %vm2358_vm13 = vmor %vm919_vm5, %vm969_vm9  ;;  %v974_v63 = vsel %vm817_vm2, %v972_v36, -inf  ;;  %v975_v41 = vsel %vm817_vm2, %v973_v38, -inf }
 0x880   : > { %v976_v0 = vmax.f32 %v974_v63, %v975_v41 }
 0x882   : > { %977 = vmax.xlane.f32.xlu1 %v976_v0 }
 0x8f5   : > { %v978_v42 = vpop.xlane.xlu1 %977 }
 0x8f6   : > { %v979_v43 = vrot.slane %v978_v42, 4 }
 0x8f8   : > { %v980_v44 = vmax.f32 %v978_v42, %v979_v43 }
 0x8fa   : > { %v981_v45 = vrot.slane %v980_v44, 2 }
 0x8fc   : > { %v982_v46 = vmax.f32 %v980_v44, %v981_v45 }
 0x8fe   : > { %v983_v47 = vrot.slane %v982_v46, 1 }
 0x900   : > { %v984_v49 = vmax.f32 %v982_v46, %v983_v47 }
 0x902   : > { %1664 = vpush %v984_v49 }
 0x933   : > { %s1665_s27 = spop %1664 }
 0x934   : > { %v986_v53 = vstv %s1665_s27  ;;  %s1324_s27 = sshll.u32 %s1321_s23, 4  ;;  %s1325_s27 = int_to_ptr.hbm [resolvable:$true] %s1324_s27 }
 0x935   : > { %vm987_vm10 = vcmp.eq.f32.partialorder %v972_v36, %v986_v53  ;;  %vm988_vm11 = vcmp.eq.f32.partialorder %v973_v38, %v986_v53 }
 0x936   : > { %v989_v54 = vsel %vm987_vm10, %v2287_v31, 16  ;;  %v990_v55 = vsel %vm988_vm11, %v2290_v32, 16 }
 0x937   : > { %v991_v56 = vsel %vm817_vm2, %v989_v54, 2147483647  ;;  %v992_v57 = vsel %vm817_vm2, %v990_v55, 2147483647 }
 0x938   : > { %vm993_vm6 = vcmp.lt.s32.totalorder %v991_v56, %v992_v57 }
 0x939   : > { %v994_v58 = vsel %vm993_vm6, %v991_v56, %v992_v57 }
 0x93a   : > { %v996_v59 = vshra.s32 %v994_v58, 16  ;;  %v995_v61 = vand.u32 65535, %v994_v58 }
 0x93c   : > { %v998_v60 = vcvt.s32.f32 %v996_v59  ;;  %v997_v3 = vcvt.s32.f32 %v995_v61 }
 0x93e   : > { %999 = vmin.xlane.f32.xlu2 %v998_v60 }
 0x9b1   : > { %v1000_v62 = vpop.xlane.xlu2 %999 }
 0x9b2   : > { %vm1001_vm7 = vcmp.eq.f32.partialorder %v998_v60, %v1000_v62  ;;  %v1006_v5 = vcvt.f32.s32 %v1000_v62 }
 0x9b3   : > { %v1002_v4 = vsel %vm1001_vm7, %v997_v3, inf }
 0x9b4   : > { %1003 = vmin.xlane.f32.xlu0 %v1002_v4  ;;  %v1007_v2 = vshll.u32 %v1006_v5, 16 }
 0xa27   : > { %v1004_v1 = vpop.xlane.xlu0 %1003 }
 0xa28   : > { %v1005_v6 = vcvt.f32.s32 %v1004_v1  ;;  %v1641_v1 = vld [vmem:[#allocation8 + $0x74] sm:$0xf] }
 0xa2a   : > { %v1008_v7 = vadd.s32 %v1007_v2, %v1005_v6  ;;  %v1559_v2 = vld [vmem:[#allocation8 + $0x78] sm:$0xf0]  ;;  %v1639_v6 = vld [vmem:[#allocation8 + $0x64] sm:$0xf] }
 0xa2c   : > { %v1009_v8 = vrot.slane %v1008_v7, 4 }
 0xa2e   : > { %vm1010_vm14 = vcmp.lt.s32.totalorder %v1008_v7, %v1009_v8 }
 0xa2f   : > { %v1011_v12 = vsel %vm1010_vm14, %v1008_v7, %v1009_v8  ;;  %v1562_v7 = vor.u32 %v1641_v1, %v1559_v2  ;;  %v1551_v8 = vld [vmem:[#allocation8 + $0x68] sm:$0xf0]  ;;  %v578_v2 = vperm.slane %v2224_v40, 1 }
 0xa30   : > { %v1012_v13 = vrot.slane %v1011_v12, 2 }
 0xa31   : > { %675 = vmatpush.bf16.msra.mxu2 %v1562_v7 }
 0xa32   : > { %vm1013_vm15 = vcmp.lt.s32.totalorder %v1011_v12, %v1012_v13 }
 0xa33   : > { %v1014_v14 = vsel %vm1013_vm15, %v1011_v12, %v1012_v13  ;;  %v1554_v12 = vor.u32 %v1639_v6, %v1551_v8  ;;  %v1637_v13 = vld [vmem:[#allocation8 + $0x54] sm:$0xf] }
 0xa34   : > { %v1015_v15 = vrot.slane %v1014_v14, 1 }
 0xa35   : > { %676 = vmatpush.bf16.msra.mxu2 %v1554_v12 }
 0xa36   : > { %vm1016_vm3 = vcmp.lt.s32.totalorder %v1014_v14, %v1015_v15 }
 0xa37   : > { %v1017_v16 = vsel %vm1016_vm3, %v1014_v14, %v1015_v15  ;;  %v1543_v14 = vld [vmem:[#allocation8 + $0x58] sm:$0xf0] }
 0xa38   : > { %1666 = vpush %v1017_v16  ;;  %v1546_v15 = vor.u32 %v1637_v13, %v1543_v14  ;;  %v1635_v16 = vld [vmem:[#allocation8 + $0x44] sm:$0xf]  ;;  %v1142_v13 = vpack.c.bf16 %v2237_v50, %v2230_v48  ;;  %v1143_v14 = vpack.c.bf16 %v2251_v52, %v2244_v51 }
 0xa3a   : > { %677 = vmatpush.bf16.msra.mxu2 %v1546_v15  ;;  %v2013_v15 = vmov 0  }
 0xa3b   : > { %1768 = vset.pattern.permute.xlu2 %v2013_v15  ;;  %1769 = vset.pattern.permute.xlu0 %v2013_v15 }
 0xa3c   : > { %1770 = vset.pattern.permute.xlu1 %v2013_v15 }
 0xa69   : > { %s1667_s19 = spop %1666 }
 0xa6a   : > { %v1019_v18 = vstv %s1667_s19  ;;  %s1310_s19 = scalar_lea.sflag [#allocation4], %s2191_s20 }
 0xa6b   : > { %vm2369_vm4 = vcmp.eq.s32.totalorder %v2287_v31, %v1019_v18  ;;  %vm2374_vm5 = vcmp.eq.s32.totalorder %v2290_v32, %v1019_v18  ;;  %v1535_v18 = vld [vmem:[#allocation8 + $0x48] sm:$0xf0] }
 0xa6c   : > { %vm1022_vm8 = vmor %vm2354_vm12, %vm2369_vm4  ;;  %v1024_v22 = vsel %vm2369_vm4, -1e+30, %v972_v36  ;;  %v1025_v23 = vsel %vm2374_vm5, -1e+30, %v973_v38 }
 0xa6d   : > { %vm1023_vm9 = vmor %vm2358_vm13, %vm2374_vm5  ;;  %v1026_v24 = vsel %vm817_vm2, %v1024_v22, -inf  ;;  %v1027_v25 = vsel %vm817_vm2, %v1025_v23, -inf }
 0xa6e   : > { %v1028_v26 = vmax.f32 %v1026_v24, %v1027_v25  ;;  %v1633_v24 = vld [vmem:[#allocation8 + $0x34] sm:$0xf]  ;;  %v1527_v25 = vld [vmem:[#allocation8 + $0x38] sm:$0xf0] }
 0xa70   : > { %1029 = vmax.xlane.f32.xlu1 %v1028_v26  ;;  %v1077_v26 = vsub.f32 %v2281_v19, %v2292_v33 }
 0xae3   : > { %v1030_v27 = vpop.xlane.xlu1 %1029 }
 0xae4   : > { %v1031_v28 = vrot.slane %v1030_v27, 4 }
 0xae6   : > { %v1032_v29 = vmax.f32 %v1030_v27, %v1031_v28  ;;  %v1530_v27 = vor.u32 %v1633_v24, %v1527_v25  ;;  %v1649_v24 = vld [vmem:[#allocation10 + $0x30] sm:$0xff] }
 0xae8   : > { %v1033_v30 = vrot.slane %v1032_v29, 2 }
 0xaea   : > { %v1034_v34 = vmax.f32 %v1032_v29, %v1033_v30  ;;  %v1080_v29 = vmul.f32 1.442695, %v1077_v26  ;;  %v1647_v26 = vld [vmem:[#allocation10 + $0x20] sm:$0xff] }
 0xaec   : > { %v1035_v36 = vrot.slane %v1034_v34, 1 }
 0xaee   : > { %v1036_v63 = vmax.f32 %v1034_v34, %v1035_v36 }
 0xaf0   : > { %1668 = vpush %v1036_v63  ;;  %v1519_v63 = vld [vmem:[#allocation8 + $0x28] sm:$0xf0] }
 0xaf1   : > { %v1522_v20 = vor.u32 %v1631_v35, %v1519_v63 }
 0xb21   : > { %s1669_s24 = spop %1668 }
 0xb22   : > { %v1038_v38 = vstv %s1669_s24  ;;  %s1943_s24 = sshra.s32 %s1325_s27, 4  ;;  %s1944_s24 = int_to_ptr.hbm [resolvable:$true] %s1943_s24 }
 0xb23   : > { %vm1039_vm10 = vcmp.eq.f32.partialorder %v1024_v22, %v1038_v38  ;;  %vm1040_vm11 = vcmp.eq.f32.partialorder %v1025_v23, %v1038_v38  ;;  %v1538_v22 = vor.u32 %v1635_v16, %v1535_v18  ;;  %v1076_v23 = vsub.f32 %v2279_v17, %v2292_v33  ;;  %v1629_v38 = vld [vmem:[#allocation8 + $0x14] sm:$0xf]  ;;  %s1945_s17 = scalar_lea.hbm %s1944_s24, 16  ;;  %p1950_p2 = scmp.lt.s32.totalorder %s1944_s24, %s2482_s10 }
 0xb24   : > { %v1041_v41 = vsel %vm1039_vm10, %v2287_v31, 16  ;;  %v1042_v0 = vsel %vm1040_vm11, %v2290_v32, 16  ;;  %p1946_p4 = scmp.ne.s32.totalorder %s1944_s24, %s1945_s17  ;;  %p1951_p9 = scmp.lt.s32.totalorder %s1949_s3, %s1945_s17 }
 0xb25   : > { %v1043_v42 = vsel %vm817_vm2, %v1041_v41, 2147483647  ;;  %v1044_v43 = vsel %vm817_vm2, %v1042_v0, 2147483647  ;;  %678 = vmatpush.bf16.msra.mxu2 %v1538_v22  ;;  %v1078_v28 = vmul.f32 1.442695, %v1076_v23 }
 0xb26   : > { %vm1045_vm6 = vcmp.lt.s32.totalorder %v1043_v42, %v1044_v43  ;;  %v1511_v41 = vld [vmem:[#allocation8 + $0x18] sm:$0xf0]  ;;  %p1947_p8 = pnand %p1946_p4, %p2158_p3  ;;  %p1952_p10 = por %p1951_p9, %p1950_p2 }
 0xb27   : > { %v1046_v44 = vsel %vm1045_vm6, %v1043_v42, %v1044_v43  ;;  %1773 = vpow2.f32 %v1078_v28  ;;  %v1514_v0 = vor.u32 %v1629_v38, %v1511_v41  ;;  %v1506_v42 = vor.u32 %v1627_v39, %v1503_v21  ;;  %v1650_v23 = vld [vmem:[#allocation10 + $0x38] sm:$0xff] }
 0xb28   : > { %v1048_v45 = vshra.s32 %v1046_v44, 16  ;;  %v1047_v47 = vand.u32 65535, %v1046_v44  ;;  %1775 = vpow2.f32 %v1080_v29  ;;  %1293 = vmatpush.bf16.msra.mxu3 %v1650_v23  ;;  %v1646_v29 = vld [vmem:[#allocation10 + $0x18] sm:$0xff]  ;;  %p1948_p11 = pneg %p1947_p8 }
 0xb29   : > { %679 = vmatpush.bf16.msra.mxu2 %v1530_v27 }
 0xb2a   : > { %v1050_v46 = vcvt.s32.f32 %v1048_v45  ;;  %v1049_v53 = vcvt.s32.f32 %v1047_v47  ;;  %p1953_p12 = pnand %p1952_p10, %p1948_p11 }
 0xb2c   : > { %1051 = vmin.xlane.f32.xlu2 %v1050_v46  ;;  %1294 = vmatpush.bf16.msra.mxu3 %v1649_v24 }
 0xb2d   : > { %v1774_v34 = vpop.eup %1773  ;;  %680 = vmatpush.bf16.msra.mxu2 %v1522_v20 }
 0xb2e   : > { %v1776_v17 = vpop.eup %1775 }
 0xb31   : > { %681 = vmatpush.bf16.msra.mxu2 %v1514_v0 }
 0xb35   : > { %682 = vmatpush.bf16.msra.mxu2 %v1506_v42  ;;  %v1645_v42 = vld [vmem:[#allocation10 + $0x10] sm:$0xff] }
 0xb38   : > { %683 = vmatmul.bf16.vlgmr.msra.gmra.mxu2 %v2218_v37 }
 0xb9f   : > { %v1052_v49 = vpop.xlane.xlu2 %1051 }
 0xba0   : > { %vm1053_vm7 = vcmp.eq.f32.partialorder %v1050_v46, %v1052_v49  ;;  %v1058_v55 = vcvt.f32.s32 %v1052_v49 }
 0xba1   : > { %v1054_v54 = vsel %vm1053_vm7, %v1049_v53, inf }
 0xba2   : > { %1055 = vmin.xlane.f32.xlu0 %v1054_v54  ;;  %v1059_v57 = vshll.u32 %v1058_v55, 16 }
 0xbbb   : > { %v684_v1 = vpop.f32.mrf.mxu2 }
 0xbbc   : > { %v685_v6 = vadd.f32 %v684_v1, %v578_v2 }
 0xbc3   : > { %v686_v7 = vpop.f32.mrf.mxu2 }
 0xbc4   : > { %v687_v8 = vadd.f32 %v686_v7, %v578_v2 }
 0xbc6   : > { %v1144_v12 = vpack.c.bf16 %v687_v8, %v685_v6 }
 0xbc8   : > { %1158 = vmatpush.bf16.msrb.mxu2 %v1144_v12 }
 0xbcb   : > { %1577 = vmatmul.msk.bf16.vlgmr.msrb.gmra.mxu2 %vm689_vm0, %v1142_v13 }
 0xbdb   : > { %1578 = vmatmul.msk.bf16.gmra.mxu2 %vm689_vm0, %v1143_v14 }
 0xc15   : > { %v1056_v56 = vpop.xlane.xlu0 %1055 }
 0xc16   : > { %v1057_v58 = vcvt.f32.s32 %v1056_v56 }
 0xc18   : > { %v1060_v59 = vadd.s32 %v1059_v57, %v1057_v58 }
 0xc1a   : > { %v1061_v60 = vrot.slane %v1060_v59, 4 }
 0xc1c   : > { %vm1062_vm14 = vcmp.lt.s32.totalorder %v1060_v59, %v1061_v60 }
 0xc1d   : > { %v1063_v61 = vsel %vm1062_vm14, %v1060_v59, %v1061_v60 }
 0xc1e   : > { %v1064_v62 = vrot.slane %v1063_v61, 2 }
 0xc20   : > { %vm1065_vm15 = vcmp.lt.s32.totalorder %v1063_v61, %v1064_v62 }
 0xc21   : > { %v1066_v3 = vsel %vm1065_vm15, %v1063_v61, %v1064_v62 }
 0xc22   : > { %v1067_v4 = vrot.slane %v1066_v3, 1 }
 0xc24   : > { %vm1068_vm3 = vcmp.lt.s32.totalorder %v1066_v3, %v1067_v4 }
 0xc25   : > { %v1069_v5 = vsel %vm1068_vm3, %v1066_v3, %v1067_v4 }
 0xc26   : > { %1670 = vpush %v1069_v5 }
 0xc57   : > { %s1671_s22 = spop %1670 }
 0xc58   : > { %v1071_v30 = vstv %s1671_s22 }
 0xc59   : > { %vm1072_vm10 = vcmp.eq.s32.totalorder %v2287_v31, %v1071_v30  ;;  %vm1073_vm11 = vcmp.eq.s32.totalorder %v2290_v32, %v1071_v30 }
 0xc5a   : > { %vm1074_vm6 = vmor %vm1022_vm8, %vm1072_vm10 }
 0xc5b   : > { %vm1075_vm7 = vmor %vm1023_vm9, %vm1073_vm11  ;;  %v1082_v19 = vsel %vm1074_vm6, %v1774_v34, 0.0 }
 0xc5c   : > { %v1083_v33 = vsel %vm1075_vm7, %v1776_v17, 0.0  ;;  %v1084_v31 = vsel %vm817_vm2, %v1082_v19, 0.0 }
 0xc5d   : > { %v1085_v32 = vsel %vm817_vm2, %v1083_v33, 0.0 }
 0xc5e   : > { %v1086_v36 = vadd.f32 %v1085_v32, %v1084_v31 }
 0xc60   : > { %1087 = vadd.xlane.f32.xlu1 %v1086_v36 }
 0xcd3   : > { %v1088_v43 = vpop.xlane.xlu1 %1087 }
 0xcd4   : > { %v1089_v44 = vrot.slane %v1088_v43, 4 }
 0xcd6   : > { %v1090_v45 = vadd.f32 %v1089_v44, %v1088_v43  ;;  %v1644_v43 = vld [vmem:[#allocation10 + $0x8] sm:$0xff]  ;;  %v1643_v44 = vld [vmem:[#allocation10] sm:$0xff] }
 0xcd8   : > { %v1091_v46 = vrot.slane %v1090_v45, 2 }
 0xcda   : > { %v1092_v47 = vadd.f32 %v1091_v46, %v1090_v45 }
 0xcdc   : > { %v1093_v49 = vrot.slane %v1092_v47, 1 }
 0xcde   : > { %v1094_v53 = vadd.f32 %v1093_v49, %v1092_v47 }
 0xce0   : > { %1672 = vpush %v1094_v53 }
 0xd11   : > { %s1673_s21 = spop %1672 }
 0xd12   : > { %v1096_v54 = vstv %s1673_s21 }
 0xd13   : > { %1777 = vrcp.f32 %v1096_v54  ;;  %v1108_v58 = vand.u32 2147483648, %v1096_v54  ;;  %v1106_v60 = vand.u32 2147483647, %v1096_v54  ;;  %vm1102_vm12 = vweird.f32 %v1096_v54 }
 0xd15   : > { %v1109_v61 = vor.u32 1.1754944e-38, %v1108_v58  ;;  %vm1107_vm4 = vcmp.eq.f32.partialorder %v1106_v60, 8.507059e+37 }
 0xd19   : > { %v1778_v55 = vpop.eup %1777 }
 0xd1a   : > { %v1098_v56 = vmul.f32 %v1778_v55, %v1096_v54  ;;  %vm1103_vm2 = vweird.f32 %v1778_v55 }
 0xd1b   : > { %vm1104_vm13 = vmor %vm1102_vm12, %vm1103_vm2 }
 0xd1c   : > { %v1099_v57 = vsub.f32 1.0, %v1098_v56 }
 0xd1e   : > { %v1100_v59 = vmul.f32 %v1778_v55, %v1099_v57 }
 0xd20   : > { %v1101_v37 = vadd.f32 %v1778_v55, %v1100_v59 }
 0xd22   : > { %v1105_v62 = vsel %vm1104_vm13, %v1778_v55, %v1101_v37 }
 0xd23   : > { %v1110_v3 = vsel %vm1107_vm4, %v1109_v61, %v1105_v62 }
 0xd24   : > { %v1112_v4 = vmul.f32 %v1110_v3, %v1083_v33  ;;  %v1111_v5 = vmul.f32 %v1110_v3, %v1082_v19 }
 0xd26   : > { %1127 = vmatpush.msrb.mxu1 %v1112_v4 }
 0xd28   : > { %1128 = vmatpush.msrb.mxu1 %v1111_v5 }
 0xd29   : > { %1573 = vmatmul.msk.f32.vlgmr.msrb.gmra.mxu1 %vm689_vm0, %v2230_v48  ;;  %v1160_v48 = vpop.f32.mrf.mxu2 }
 0xd31   : > { %1574 = vmatmul.msk.f32.gmra.mxu1 %vm689_vm0, %v2237_v50  ;;  %v1162_v50 = vpop.f32.mrf.mxu2 }
 0xd39   : > { %1575 = vmatmul.msk.f32.gmra.mxu1 %vm689_vm0, %v2244_v51  ;;  %v1165_v51 = vpop.f32.mrf.mxu2 }
 0xd41   : > { %1576 = vmatmul.msk.f32.gmra.mxu1 %vm689_vm0, %v2251_v52  ;;  %v1648_v52 = vld [vmem:[#allocation10 + $0x28] sm:$0xff]  ;;  %v1167_v27 = vpop.f32.mrf.mxu2 }
 0xd42   : > { %1295 = vmatpush.bf16.msra.mxu3 %v1648_v52 }
 0xd46   : > { %1296 = vmatpush.bf16.msra.mxu3 %v1647_v26 }
 0xd4a   : > { %1297 = vmatpush.bf16.msra.mxu3 %v1646_v29 }
 0xd4e   : > { %1298 = vmatpush.bf16.msra.mxu3 %v1645_v42 }
 0xd52   : > { %1299 = vmatpush.bf16.msra.mxu3 %v1644_v43 }
 0xd56   : > { %1300 = vmatpush.bf16.msra.mxu3 %v1643_v44 }
 0xda6   : > { %v1130_v40 = vpop.f32.mrf.mxu1 }
 0xda7   : > { %1172 = vperm.xlu2 %1768, %v1130_v40  }
 0xdae   : > { %v1133_v16 = vpop.f32.mrf.mxu1 }
 0xdaf   : > { %1177 = vperm.xlu0 %1769, %v1133_v16  }
 0xdb6   : > { %v1136_v18 = vpop.f32.mrf.mxu1 }
 0xdb7   : > { %1184 = vperm.xlu1 %1770, %v1136_v18  }
 0xdbe   : > { %v1139_v22 = vpop.f32.mrf.mxu1 }
 0xdbf   : > { %1189 = vperm.xlu2 %1768, %v1139_v22  }
 0xe01   : > { %v1173_v25 = vpop.permute.xlu2 %1172 }
 0xe02   : > { %v1198_v19 = vmul.f32 %v1173_v25, %v1165_v51  ;;  %v1180_v36 = vmul.f32 %v1173_v25, %v1160_v48 }
 0xe19   : > { %v1190_v30 = vpop.permute.xlu2 %1189 }
 0xe1a   : > { %v1197_v33 = vmul.f32 %v1190_v30, %v1162_v50  ;;  %v1193_v35 = vmul.f32 %v1190_v30, %v1167_v27 }
 0xe21   : > { %v1178_v28 = vpop.permute.xlu0 %1177 }
 0xe22   : > { %v1199_v34 = vmul.f32 %v1178_v28, %v1167_v27  ;;  %v1181_v63 = vmul.f32 %v1178_v28, %v1162_v50 }
 0xe24   : > { %v1201_v20 = vsub.f32 %v1197_v33, %v1199_v34  ;;  %v1195_v39 = vadd.f32 %v1193_v35, %v1181_v63 }
 0xe29   : > { %v1185_v17 = vpop.permute.xlu1 %1184 }
 0xe2a   : > { %v1192_v31 = vmul.f32 %v1185_v17, %v1165_v51  ;;  %v1196_v32 = vmul.f32 %v1185_v17, %v1160_v48 }
 0xe2c   : > { %v1200_v38 = vsub.f32 %v1196_v32, %v1198_v19  ;;  %v1194_v41 = vadd.f32 %v1192_v31, %v1180_v36 }
 0xe2e   : > { %v1204_v0 = vpack.c.bf16 %v1201_v20, %v1200_v38  ;;  %v1203_v21 = vpack.c.bf16 %v1195_v39, %v1194_v41 }
 0xe30   : > { %1214 = vmatpush.bf16.msra.mxu0 %v1204_v0 }
 0xe34   : > { %1215 = vmatpush.bf16.msra.mxu0 %v1203_v21 }
 0xe37   : > { %1579 = vmatmul.msk.bf16.vlgmr.msra.gmra.mxu0 %vm780_vm1, %v1202_v11 }
 0xeb4   : > { %v1217_v45 = vpop.f32.mrf.mxu0 }
 0xeb5   : > { %v1222_v47 = vmul.f32 0.0625, %v1217_v45 }
 0xebc   : > { %v1219_v46 = vpop.f32.mrf.mxu0 }
 0xebd   : > { %v1223_v49 = vmul.f32 0.0625, %v1219_v46 }
 0xebf   : > { %v1224_v53 = vpack.c.bf16 %v1223_v49, %v1222_v47 }
 0xec1   : > { %1301 = vmatmul.bf16.vlgmr.msra.gmra.mxu3 %v1224_v53 }
 0xf44   : > { %v1302_v10 = vpop.f32.mrf.mxu3 }
 0xf45   : > { %v1303_v11 = vadd.f32 %v1772_v9, %v1302_v10 }
 0xf47   : > { %1307 = vst [vmem:[%s458_s30] sm:$0xff] %v1303_v11 }
 0xf4c   : > { %v1304_v54 = vpop.f32.mrf.mxu3 }
 0xf4d   : > { %v1305_v55 = vadd.f32 %v1772_v9, %v1304_v54 }
 0xf4f   : > { %1308 = vst [vmem:[%s458_s30 + $0x8] sm:$0xff] %v1305_v55 }
 0xf50   : > { %1956 = shalt.err (!%p1953_p12)
}
 0xf51   : > { %s2014_s20 = smov 128   ;;  %s2015_s11 = smov 8  }
 0xf52   : > { %1692 = dma.vmem_to_hbm [thread:$0]  (%p2158_p3), %s1323_s25, 256, %s1325_s27, %s1310_s19, %s2014_s20, %s2014_s20, %s2015_s11  }
 0xf53 PF: > { %s1339_s18 = sand.u32 1, %s1991_s13   ;;  %p2518_p13 = scmp.ge.s32.totalorder %s2003_s16, 2 }
 0xf54   : > { %s1340_s23 = scalar_lea.sflag [#allocation4], %s1339_s18 }
 0xf55   : > { %p1712_p0 = pnand %p2518_p13, %p2106_p6 }
 0xf57   : > { %p1713_p5 = pneg %p1712_p0 }
 0xf59   : > { %1986 = dma.done.wait (%p1713_p5), %s1340_s23, 256  }
 0xf5a   : > { %1988 = vsyncadd (%p1713_p5), %s1340_s23, 4294967040  ;;  %p25_p7 = scmp.ge.s32.totalorder %s2148_s28, 4   ;;  %s2519_s13 = smov %s1995_s14 }
 0xf5b   : > { %s2520_s14 = smov %s1999_s15  ;;  %s2521_s15 = smov %s2164_s4 }
 0xf5c   : > { %s2522_s16 = smov %s2148_s28  ;;  %27 = sbr.rel (!%p25_p7) target bundleno = 11 (0xb), region = 124 }
 0xf61   :  { %1346 = vsyncpa [#allocation3], 1 }
 0xf62   :  { %1348 = vsyncpa [#allocation3 + $0x1], 1 }
 0xf63   :  { %1349 = vsyncpa [#allocation6], 1 }
 0xf64   :  { %1350 = vsyncpa [#allocation9], 1 }
 0xf65   :  { %1351 = vsyncpa [#allocation4], 1 }
 0xf66   :  { %1353 = vsyncpa [#allocation4 + $0x1], 1 }

</bundles_post_ra>
